<compile_context>
chip_gen: v7x
topology: tpu7x:2x2x1
jax: 0.10.0
libtpu: 0.0.40
codegen_flags: <defaults>
</compile_context>

<pallas_src>
import jax
import jax.numpy as jnp
from jax.experimental import pallas as pl
from jax.experimental.pallas import tpu as pltpu

LATENT_DIM = 50
D_IN = 784
D_HID = 600
D_HID_PAD = 640            # 600 padded up to a multiple of 128 (lane-dense)
D_OUT_PAD = 128            # mu(50) + logvar(50) fused, padded to 128 lanes


def _round_up(n, m):
    return ((n + m - 1) // m) * m


def _softplus(z):
    # Numerically-stable softplus (f32), matches torch.nn.functional.softplus.
    return jnp.maximum(z, 0.0) + jnp.log1p(jnp.exp(-jnp.abs(z)))


def _make_encoder_kernel(bm, chunk=128):
    """Kernel over one [bm, 784] batch tile, processed in `chunk`-row pieces.

    Sub-chunking gives the scheduler independent MXU / EUP work to overlap and
    bounds the f32 h1/h2 live ranges (less spill at large bm)."""
    if bm % chunk != 0:
        chunk = bm
    n_chunks = bm // chunk

    def kernel(x_ref, w1_ref, b1_ref, w2_ref, b2_ref, w3_ref, b3_ref, out_ref):
        w1 = w1_ref[...]            # bf16 [784, 640]
        w2 = w2_ref[...]            # bf16 [640, 640]
        w3 = w3_ref[...]            # bf16 [640, 128]
        b1 = b1_ref[...]            # f32  [1, 640]
        b2 = b2_ref[...]            # f32  [1, 640]
        b3 = b3_ref[...]            # f32  [1, 128]
        for c in range(n_chunks):   # static unroll; chunks are independent
            rows = pl.ds(c * chunk, chunk)
            x = x_ref[rows, :]                                      # bf16 [chunk, 784]
            z1 = jnp.dot(x, w1, preferred_element_type=jnp.float32) + b1
            h1 = _softplus(z1).astype(jnp.bfloat16)
            z2 = jnp.dot(h1, w2, preferred_element_type=jnp.float32) + b2
            h2 = _softplus(z2).astype(jnp.bfloat16)
            # Fused mu/logvar head: one lane-dense, unmasked [chunk, 128] store.
            out_ref[rows, :] = (
                jnp.dot(h2, w3, preferred_element_type=jnp.float32) + b3)

    return kernel


def prepare_encoder_params(params):
    """One-time prep (call once at init, NOT per forward):
    pad hidden 600->640, fuse the mu/logvar heads into one [640, 128] matmul,
    cast weights to bf16, keep biases f32.

    Correctness note: padded h columns carry softplus(0)=ln 2, so the padded
    ROWS of W2/W3 must stay zero (they do: jnp.pad with zeros) for the outputs
    to be unaffected."""
    w1, b1, w2, b2, w31, b31, w32, b32 = params
    ph = D_HID_PAD - D_HID
    po = D_OUT_PAD - 2 * LATENT_DIM

    w1p = jnp.pad(w1, ((0, 0), (0, ph))).astype(jnp.bfloat16)       # [784, 640]
    b1p = jnp.pad(b1, ((0, 0), (0, ph))).astype(jnp.float32)        # [1, 640]
    w2p = jnp.pad(w2, ((0, ph), (0, ph))).astype(jnp.bfloat16)      # [640, 640]
    b2p = jnp.pad(b2, ((0, 0), (0, ph))).astype(jnp.float32)        # [1, 640]
    w3 = jnp.concatenate([w31, w32], axis=1)                        # [600, 100]
    b3 = jnp.concatenate([b31, b32], axis=1)                        # [1, 100]
    w3p = jnp.pad(w3, ((0, ph), (0, po))).astype(jnp.bfloat16)      # [640, 128]
    b3p = jnp.pad(b3, ((0, 0), (0, po))).astype(jnp.float32)        # [1, 128]
    return w1p, b1p, w2p, b2p, w3p, b3p


def _resident_spec(shape):
    """Grid-invariant operand: constant index_map (DMA'd once, stays VMEM
    resident) and single-buffered -- the default second buffer is dead weight."""
    index_map = lambda i: (0,) * len(shape)
    try:
        return pl.BlockSpec(shape, index_map, pipeline_mode=pl.Buffered(1))
    except TypeError:  # older jax without pipeline_mode kwarg
        return pl.BlockSpec(shape, index_map)


def _choose_bm(B):
    if B <= 128:
        # One small tile; no point padding a tiny batch up to 128 rows.
        return _round_up(max(B, 8), 8)
    # Large batch: tiles of 128..512 rows, and >=2 tiles so both v7x
    # TensorCores get a share of the "parallel" batch axis.
    return max(128, min(512, _round_up(pl.cdiv(B, 2), 128)))


def encoder_forward(x, prepared_params, *, bm=None):
    """x: [B, 784] float32.  prepared_params: output of prepare_encoder_params.
    Returns (mu [B, 50], logvar [B, 50]) in float32."""
    w1p, b1p, w2p, b2p, w3p, b3p = prepared_params

    B = x.shape[0]
    if bm is None:
        bm = _choose_bm(B)
    bm = _round_up(bm, 8)                       # sublane alignment for x block
    b_pad = _round_up(B, bm)

    x = x.astype(jnp.bfloat16)                  # halve the activation DMA
    if b_pad != B:
        x = jnp.pad(x, ((0, b_pad - B), (0, 0)))
    grid = (b_pad // bm,)

    # Advisory cost hint for XLA's scheduler.
    flops = 2 * b_pad * (D_IN * D_HID_PAD + D_HID_PAD * D_HID_PAD
                         + D_HID_PAD * D_OUT_PAD)
    transcendentals = 4 * b_pad * D_HID_PAD            # exp + log1p, two layers
    bytes_accessed = (
        2 * (b_pad * D_IN                              # x (bf16)
             + D_IN * D_HID_PAD                        # W1 (bf16)
             + D_HID_PAD * D_HID_PAD                   # W2 (bf16)
             + D_HID_PAD * D_OUT_PAD)                  # W3 (bf16)
        + 4 * (2 * D_HID_PAD + D_OUT_PAD               # biases (f32)
               + b_pad * D_OUT_PAD))                   # output (f32)

    out = pl.pallas_call(
        _make_encoder_kernel(bm),
        out_shape=jax.ShapeDtypeStruct((b_pad, D_OUT_PAD), jnp.float32),
        grid_spec=pltpu.PrefetchScalarGridSpec(
            num_scalar_prefetch=0,
            grid=grid,
            in_specs=[
                pl.BlockSpec((bm, D_IN), lambda i: (i, 0)),   # x tile (bf16)
                _resident_spec((D_IN, D_HID_PAD)),            # W1  [784, 640]
                _resident_spec((1, D_HID_PAD)),               # b1
                _resident_spec((D_HID_PAD, D_HID_PAD)),       # W2  [640, 640]
                _resident_spec((1, D_HID_PAD)),               # b2
                _resident_spec((D_HID_PAD, D_OUT_PAD)),       # W3  [640, 128]
                _resident_spec((1, D_OUT_PAD)),               # b3
            ],
            out_specs=pl.BlockSpec((bm, D_OUT_PAD), lambda i: (i, 0)),
        ),
        compiler_params=pltpu.CompilerParams(
            dimension_semantics=("parallel",),     # batch tiles -> megacore
            vmem_limit_bytes=32 << 20,             # v7x-safe; footprint << 32 MiB
        ),
        cost_estimate=pl.CostEstimate(
            flops=flops,
            transcendentals=transcendentals,
            bytes_accessed=bytes_accessed,
        ),
    )(x, w1p, b1p, w2p, b2p, w3p, b3p)

    mu = out[:B, :LATENT_DIM]
    logvar = out[:B, LATENT_DIM:2 * LATENT_DIM]
    return mu, logvar


def init_params(key):
    """Deterministic init mimicking nn.Linear default (uniform +-1/sqrt(fan_in)).
    Weights are stored transposed relative to PyTorch: [in, out]."""
    def linear(key, fan_in, fan_out):
        kw, kb = jax.random.split(key)
        bound = 1.0 / jnp.sqrt(fan_in)
        w = jax.random.uniform(kw, (fan_in, fan_out), jnp.float32, -bound, bound)
        b = jax.random.uniform(kb, (1, fan_out), jnp.float32, -bound, bound)
        return w, b

    k1, k2, k3, k4 = jax.random.split(key, 4)
    w1, b1 = linear(k1, D_IN, D_HID)
    w2, b2 = linear(k2, D_HID, D_HID)
    w31, b31 = linear(k3, D_HID, LATENT_DIM)
    w32, b32 = linear(k4, D_HID, LATENT_DIM)
    return (w1, b1, w2, b2, w31, b31, w32, b32)


def encoder_reference_f32(x, params):
    """Pure-f32 JAX reference (matches the PyTorch module exactly)."""
    w1, b1, w2, b2, w31, b31, w32, b32 = params
    h1 = jax.nn.softplus(x @ w1 + b1)
    h2 = jax.nn.softplus(h1 @ w2 + b2)
    return h2 @ w31 + b31, h2 @ w32 + b32


def encoder_reference_bf16(x, params):
    """Reference with the same dtype flow as the kernel (bf16 MXU inputs,
    f32 accumulation / bias / softplus)."""
    w1, b1, w2, b2, w31, b31, w32, b32 = params
    bf = jnp.bfloat16
    h1 = jax.nn.softplus(
        jnp.dot(x.astype(bf), w1.astype(bf),
                preferred_element_type=jnp.float32) + b1)
    h2 = jax.nn.softplus(
        jnp.dot(h1.astype(bf), w2.astype(bf),
                preferred_element_type=jnp.float32) + b2)
    h2b = h2.astype(bf)
    mu = jnp.dot(h2b, w31.astype(bf), preferred_element_type=jnp.float32) + b31
    lv = jnp.dot(h2b, w32.astype(bf), preferred_element_type=jnp.float32) + b32
    return mu, lv


if __name__ == "__main__":
    key = jax.random.PRNGKey(0)
    kp, kx = jax.random.split(key)
    params = init_params(kp)
    # Hoisted out of the per-call path: pad/fuse/cast the weights ONCE.
    prepared = prepare_encoder_params(params)

    batch = 8
    x = jax.random.normal(kx, (batch, D_IN), dtype=jnp.float32)

    mu, logvar = encoder_forward(x, prepared)
    jax.block_until_ready((mu, logvar))

    assert mu.shape == (batch, LATENT_DIM)
    assert logvar.shape == (batch, LATENT_DIM)

    # Tight check against a reference with the identical bf16 dtype flow.
    mu_b, lv_b = encoder_reference_bf16(x, params)
    assert jnp.allclose(mu, mu_b, atol=2e-3, rtol=2e-3)
    assert jnp.allclose(logvar, lv_b, atol=2e-3, rtol=2e-3)

    # Loose sanity check against the pure-f32 reference (bf16 quantization
    # of weights/activations accounts for the gap).
    mu_f, lv_f = encoder_reference_f32(x, params)
    assert jnp.allclose(mu, mu_f, atol=5e-2, rtol=5e-2)
    assert jnp.allclose(logvar, lv_f, atol=5e-2, rtol=5e-2)

    print("KERNEL_OK")
</pallas_src>

<mosaic_0001>
module attributes {stable_mosaic.version = 11 : i64} {
  func.func @kernel(%arg0: i32, %arg1: memref<8x784xbf16, #tpu.memory_space<vmem>>, %arg2: memref<784x640xbf16, #tpu.memory_space<vmem>>, %arg3: memref<1x640xf32, #tpu.memory_space<vmem>>, %arg4: memref<640x640xbf16, #tpu.memory_space<vmem>>, %arg5: memref<1x640xf32, #tpu.memory_space<vmem>>, %arg6: memref<640x128xbf16, #tpu.memory_space<vmem>>, %arg7: memref<1x128xf32, #tpu.memory_space<vmem>>, %arg8: memref<8x128xf32, #tpu.memory_space<vmem>>) attributes {dimension_semantics = [#tpu.dimension_semantics<parallel>], iteration_bounds = array<i64: 1>, scalar_prefetch = 0 : i64, scratch_operands = 0 : i64, tpu.core_type = #tpu.core_type<tc>, window_params = [{transform_indices = @transform_0, window_bounds = array<i64: 8, 784>}, {pipeline_mode = #tpu.pipeline_mode<synchronous>, transform_indices = @transform_1, window_bounds = array<i64: 784, 640>}, {pipeline_mode = #tpu.pipeline_mode<synchronous>, transform_indices = @transform_2, window_bounds = array<i64: 1, 640>}, {pipeline_mode = #tpu.pipeline_mode<synchronous>, transform_indices = @transform_3, window_bounds = array<i64: 640, 640>}, {pipeline_mode = #tpu.pipeline_mode<synchronous>, transform_indices = @transform_4, window_bounds = array<i64: 1, 640>}, {pipeline_mode = #tpu.pipeline_mode<synchronous>, transform_indices = @transform_5, window_bounds = array<i64: 640, 128>}, {pipeline_mode = #tpu.pipeline_mode<synchronous>, transform_indices = @transform_6, window_bounds = array<i64: 1, 128>}, {transform_indices = @transform_7, window_bounds = array<i64: 8, 128>}]} {
    %c0 = arith.constant 0 : index
    %c0_0 = arith.constant 0 : index
    %0 = vector.load %arg2[%c0, %c0_0] : memref<784x640xbf16, #tpu.memory_space<vmem>>, vector<784x640xbf16>
    %c0_1 = arith.constant 0 : index
    %c0_2 = arith.constant 0 : index
    %1 = vector.load %arg4[%c0_1, %c0_2] : memref<640x640xbf16, #tpu.memory_space<vmem>>, vector<640x640xbf16>
    %c0_3 = arith.constant 0 : index
    %c0_4 = arith.constant 0 : index
    %2 = vector.load %arg6[%c0_3, %c0_4] : memref<640x128xbf16, #tpu.memory_space<vmem>>, vector<640x128xbf16>
    %c0_5 = arith.constant 0 : index
    %c0_6 = arith.constant 0 : index
    %3 = vector.load %arg3[%c0_5, %c0_6] : memref<1x640xf32, #tpu.memory_space<vmem>>, vector<1x640xf32>
    %c0_7 = arith.constant 0 : index
    %c0_8 = arith.constant 0 : index
    %4 = vector.load %arg5[%c0_7, %c0_8] : memref<1x640xf32, #tpu.memory_space<vmem>>, vector<1x640xf32>
    %c0_9 = arith.constant 0 : index
    %c0_10 = arith.constant 0 : index
    %5 = vector.load %arg7[%c0_9, %c0_10] : memref<1x128xf32, #tpu.memory_space<vmem>>, vector<1x128xf32>
    %c0_11 = arith.constant 0 : index
    %c0_12 = arith.constant 0 : index
    %6 = vector.load %arg1[%c0_11, %c0_12] : memref<8x784xbf16, #tpu.memory_space<vmem>>, vector<8x784xbf16>
    %cst = arith.constant dense<0.000000e+00> : vector<8x640xf32>
    %7 = tpu.matmul %6, %0, %cst {dimension_numbers = #tpu.dot_dimension_numbers<[1], [0], [0], [1], [0, 0, 1, 1], [], []>} : vector<8x784xbf16>, vector<784x640xbf16>, vector<8x640xf32> -> vector<8x640xf32>
    %8 = vector.broadcast %3 : vector<1x640xf32> to vector<8x640xf32>
    %9 = arith.addf %7, %8 : vector<8x640xf32>
    %cst_13 = arith.constant 0.000000e+00 : f32
    %10 = vector.broadcast %cst_13 : f32 to vector<8x640xf32>
    %11 = arith.maximumf %9, %10 : vector<8x640xf32>
    %12 = math.absf %9 : vector<8x640xf32>
    %cst_14 = arith.constant 0.000000e+00 : f32
    %13 = vector.broadcast %cst_14 : f32 to vector<8x640xf32>
    %14 = arith.subf %13, %12 : vector<8x640xf32>
    %15 = math.exp %14 : vector<8x640xf32>
    %16 = math.log1p %15 : vector<8x640xf32>
    %17 = arith.addf %11, %16 : vector<8x640xf32>
    %18 = arith.truncf %17 : vector<8x640xf32> to vector<8x640xbf16>
    %cst_15 = arith.constant dense<0.000000e+00> : vector<8x640xf32>
    %19 = tpu.matmul %18, %1, %cst_15 {dimension_numbers = #tpu.dot_dimension_numbers<[1], [0], [0], [1], [0, 0, 1, 1], [], []>} : vector<8x640xbf16>, vector<640x640xbf16>, vector<8x640xf32> -> vector<8x640xf32>
    %20 = vector.broadcast %4 : vector<1x640xf32> to vector<8x640xf32>
    %21 = arith.addf %19, %20 : vector<8x640xf32>
    %cst_16 = arith.constant 0.000000e+00 : f32
    %22 = vector.broadcast %cst_16 : f32 to vector<8x640xf32>
    %23 = arith.maximumf %21, %22 : vector<8x640xf32>
    %24 = math.absf %21 : vector<8x640xf32>
    %cst_17 = arith.constant 0.000000e+00 : f32
    %25 = vector.broadcast %cst_17 : f32 to vector<8x640xf32>
    %26 = arith.subf %25, %24 : vector<8x640xf32>
    %27 = math.exp %26 : vector<8x640xf32>
    %28 = math.log1p %27 : vector<8x640xf32>
    %29 = arith.addf %23, %28 : vector<8x640xf32>
    %30 = arith.truncf %29 : vector<8x640xf32> to vector<8x640xbf16>
    %cst_18 = arith.constant dense<0.000000e+00> : vector<8x128xf32>
    %31 = tpu.matmul %30, %2, %cst_18 {dimension_numbers = #tpu.dot_dimension_numbers<[1], [0], [0], [1], [0, 0, 1, 1], [], []>} : vector<8x640xbf16>, vector<640x128xbf16>, vector<8x128xf32> -> vector<8x128xf32>
    %32 = vector.broadcast %5 : vector<1x128xf32> to vector<8x128xf32>
    %33 = arith.addf %31, %32 : vector<8x128xf32>
    %c0_19 = arith.constant 0 : index
    %c0_20 = arith.constant 0 : index
    %34 = vector.load %arg8[%c0_19, %c0_20] : memref<8x128xf32, #tpu.memory_space<vmem>>, vector<8x128xf32>
    tpu.vector_store %arg8[%c0_19, %c0_20], %33 {strides = array<i32>} : memref<8x128xf32, #tpu.memory_space<vmem>>, vector<8x128xf32>,
    return
  }
  func.func @transform_0(%arg0: i32) -> (i32, i32) {
    %c0_i32 = arith.constant 0 : i32
    %c0_i32_0 = arith.constant 0 : i32
    return %arg0, %c0_i32 : i32, i32
  }
  func.func @transform_1(%arg0: i32) -> (i32, i32) {
    %c0_i32 = arith.constant 0 : i32
    %c0_i32_0 = arith.constant 0 : i32
    %c0_i32_1 = arith.constant 0 : i32
    return %c0_i32, %c0_i32_0 : i32, i32
  }
  func.func @transform_2(%arg0: i32) -> (i32, i32) {
    %c0_i32 = arith.constant 0 : i32
    %c0_i32_0 = arith.constant 0 : i32
    %c0_i32_1 = arith.constant 0 : i32
    return %c0_i32, %c0_i32_0 : i32, i32
  }
  func.func @transform_3(%arg0: i32) -> (i32, i32) {
    %c0_i32 = arith.constant 0 : i32
    %c0_i32_0 = arith.constant 0 : i32
    %c0_i32_1 = arith.constant 0 : i32
    return %c0_i32, %c0_i32_0 : i32, i32
  }
  func.func @transform_4(%arg0: i32) -> (i32, i32) {
    %c0_i32 = arith.constant 0 : i32
    %c0_i32_0 = arith.constant 0 : i32
    %c0_i32_1 = arith.constant 0 : i32
    return %c0_i32, %c0_i32_0 : i32, i32
  }
  func.func @transform_5(%arg0: i32) -> (i32, i32) {
    %c0_i32 = arith.constant 0 : i32
    %c0_i32_0 = arith.constant 0 : i32
    %c0_i32_1 = arith.constant 0 : i32
    return %c0_i32, %c0_i32_0 : i32, i32
  }
  func.func @transform_6(%arg0: i32) -> (i32, i32) {
    %c0_i32 = arith.constant 0 : i32
    %c0_i32_0 = arith.constant 0 : i32
    %c0_i32_1 = arith.constant 0 : i32
    return %c0_i32, %c0_i32_0 : i32, i32
  }
  func.func @transform_7(%arg0: i32) -> (i32, i32) {
    %c0_i32 = arith.constant 0 : i32
    %c0_i32_0 = arith.constant 0 : i32
    return %arg0, %c0_i32 : i32, i32
  }
}

</mosaic_0001>

<bundles_post_ra>
// kernel: tpu_custom_call.1
= control target key start
LH: loop header
LB: loop body
LE: loop exit
PB: predicated region body
PF: predicated region fallthrough
CT: control target
= control target key end

     0   :  { %12 = vsyncpa [#allocation3], 0  ;;  %s6408_s0 = inlined_call_operand.hbm [shape: bf16[8,784], index: 0, kind: input, shape index: {}]   ;;  %s6409_s1 = inlined_call_operand.hbm [shape: bf16[784,640], index: 1, kind: input, shape index: {}]   ;;  %s6410_s2 = inlined_call_operand.vmem [shape: f32[1,640], index: 2, kind: input, shape index: {}]   ;;  %s6411_s3 = inlined_call_operand.hbm [shape: bf16[640,640], index: 3, kind: input, shape index: {}]   ;;  %s6412_s4 = inlined_call_operand.vmem [shape: f32[1,640], index: 4, kind: input, shape index: {}]   ;;  %s6413_s5 = inlined_call_operand.hbm [shape: bf16[640,128], index: 5, kind: input, shape index: {}]   ;;  %s6414_s6 = inlined_call_operand.vmem [shape: f32[1,128], index: 6, kind: input, shape index: {}]   ;;  %s6415_s7 = inlined_call_operand.hbm [shape: f32[8,128], index: 7, kind: output, shape index: {}]  }
   0x1   :  { %13 = vsyncpa [#allocation6], 0 }
   0x2   :  { %14 = vsyncpa [#allocation9], 0 }
   0x3   :  { %15 = vsyncpa [#allocation4], 0  ;;  %s6097_s24 = smov [#allocation5]   ;;  %s5979_s28 = scalar_lea.hbm %s6409_s1, 31360 }
   0x4   :  { %s31_s25 = sshll.u32 %s6097_s24, 4  ;;  %p5980_p0 = scmp.ne.s32.totalorder %s6409_s1, %s5979_s28  ;;  %s32_s25 = int_to_ptr.vmem [resolvable:$true] %s31_s25 }
   0x5   :  { %p5983_p1 = scmp.lt.u32.totalorder %s5979_s28, %s6409_s1 }
   0x7   :  { %p5985_p2 = pnand %p5983_p1, %p5980_p0 }
   0x9   :  { %5988 = shalt.err (!%p5985_p2)
}
   0xa   :  { %s5989_s10 = scalar_lea.vmem %s32_s25, 31360  ;;  %p5994_p4 = scmp.lt.s32.totalorder %s32_s25, %s32_s25 }
   0xb   :  { %p5990_p3 = scmp.ne.s32.totalorder %s32_s25, %s5989_s10  ;;  %p5995_p5 = scmp.lt.s32.totalorder %s5989_s10, %s5989_s10 }
   0xd   :  { %p5996_p6 = por %p5995_p5, %p5994_p4 }
   0xf   :  { %p5997_p7 = pnand %p5996_p6, %p5990_p3 }
  0x11   :  { %6000 = shalt.err (!%p5997_p7)
}
  0x12   :  { %s6098_s11 = smov 320   ;;  %s6099_s12 = smov 20  }
  0x13   :  { %37 = dma.hbm_to_vmem [thread:$0]  %s6409_s1, 31360, %s32_s25, [#allocation6], %s6098_s11, %s6098_s11, %s6099_s12  }
  0x14   :  { %s6100_s15 = smov [#allocation2]   ;;  %s6101_s17 = smov [#allocation7]  }
  0x15   :  { %s22_s16 = sshll.u32 %s6100_s15, 4  ;;  %s45_s18 = sshll.u32 %s6101_s17, 4  ;;  %s23_s16 = int_to_ptr.vmem [resolvable:$true] %s22_s16  ;;  %s46_s18 = int_to_ptr.vmem [resolvable:$true] %s45_s18 }
  0x16   :  { %s6001_s21 = scalar_lea.hbm %s6408_s0, 448 }
  0x17   :  { %p6002_p8 = scmp.ne.s32.totalorder %s6408_s0, %s6001_s21  ;;  %p6005_p9 = scmp.lt.u32.totalorder %s6001_s21, %s6408_s0 }
  0x19   :  { %p6007_p10 = pnand %p6005_p9, %p6002_p8 }
  0x1b   :  { %6010 = shalt.err (!%p6007_p10)
}
  0x1c   :  { %s6011_s1 = scalar_lea.vmem %s23_s16, 448  ;;  %p6016_p12 = scmp.lt.s32.totalorder %s23_s16, %s23_s16 }
  0x1d   :  { %p6012_p11 = scmp.ne.s32.totalorder %s23_s16, %s6011_s1  ;;  %p6017_p13 = scmp.lt.s32.totalorder %s6011_s1, %s6011_s1 }
  0x1f   :  { %p6018_p0 = por %p6017_p13, %p6016_p12 }
  0x21   :  { %p6019_p1 = pnand %p6018_p0, %p6012_p11 }
  0x23   :  { %6022 = shalt.err (!%p6019_p1)
}
  0x24   :  { %25 = dma.hbm_to_vmem [thread:$0]  %s6408_s0, 448, %s23_s16, [#allocation3]  }
  0x25   :  { %s6023_s30 = scalar_lea.hbm %s6411_s3, 25600 }
  0x26   :  { %p6024_p2 = scmp.ne.s32.totalorder %s6411_s3, %s6023_s30  ;;  %p6027_p3 = scmp.lt.u32.totalorder %s6023_s30, %s6411_s3 }
  0x28   :  { %p6029_p4 = pnand %p6027_p3, %p6024_p2 }
  0x2a   :  { %6032 = shalt.err (!%p6029_p4)
}
  0x2b   :  { %s6033_s14 = scalar_lea.vmem %s46_s18, 25600  ;;  %p6038_p6 = scmp.lt.s32.totalorder %s46_s18, %s46_s18 }
  0x2c   :  { %p6034_p5 = scmp.ne.s32.totalorder %s46_s18, %s6033_s14  ;;  %p6039_p7 = scmp.lt.s32.totalorder %s6033_s14, %s6033_s14 }
  0x2e   :  { %p6040_p8 = por %p6039_p7, %p6038_p6 }
  0x30   :  { %p6041_p9 = pnand %p6040_p8, %p6034_p5 }
  0x32   :  { %6044 = shalt.err (!%p6041_p9)
}
  0x33   :  { %51 = dma.hbm_to_vmem [thread:$0]  %s6411_s3, 25600, %s46_s18, [#allocation6], %s6098_s11, %s6098_s11, %s6099_s12  }
  0x34   :  { %s6102_s16 = smov [#allocation8]   ;;  %s6045_s21 = scalar_lea.hbm %s6413_s5, 5120 }
  0x35   :  { %s59_s17 = sshll.u32 %s6102_s16, 4  ;;  %p6046_p10 = scmp.ne.s32.totalorder %s6413_s5, %s6045_s21  ;;  %s60_s17 = int_to_ptr.vmem [resolvable:$true] %s59_s17 }
  0x36   :  { %p6049_p11 = scmp.lt.u32.totalorder %s6045_s21, %s6413_s5 }
  0x38   :  { %p6051_p12 = pnand %p6049_p11, %p6046_p10 }
  0x3a   :  { %6054 = shalt.err (!%p6051_p12)
}
  0x3b   :  { %s6055_s1 = scalar_lea.vmem %s60_s17, 5120  ;;  %p6060_p0 = scmp.lt.s32.totalorder %s60_s17, %s60_s17 }
  0x3c   :  { %p6056_p13 = scmp.ne.s32.totalorder %s60_s17, %s6055_s1  ;;  %p6061_p1 = scmp.lt.s32.totalorder %s6055_s1, %s6055_s1 }
  0x3e   :  { %p6062_p2 = por %p6061_p1, %p6060_p0 }
  0x40   :  { %p6063_p3 = pnand %p6062_p2, %p6056_p13 }
  0x42   :  { %6066 = shalt.err (!%p6063_p3)
}
  0x43   :  { %s6103_s3 = smov 64   ;;  %s6104_s11 = smov 4  }
  0x44   :  { %65 = dma.hbm_to_vmem [thread:$0]  %s6413_s5, 5120, %s60_s17, [#allocation9], %s6103_s3, %s6103_s3, %s6104_s11  }
  0x45   :  { %6089 = dma.done.wait [#allocation3], 448  }
  0x46   :  { %6090 = vsyncadd [#allocation3], 4294966848 }
  0x47   :  { %6091 = dma.done.wait [#allocation6], 56960  }
  0x48   :  { %6092 = vsyncadd [#allocation6], 4294910336 }
  0x49   :  { %6093 = dma.done.wait [#allocation9], 5120  }
  0x4a   :  { %6094 = vsyncadd [#allocation9], 4294962176  ;;  %v6105_v0 = vmov 0   ;;  %v5268_v1 = vld [vmem:[#allocation5 + $0x4] ss:$20 sps:$4 sm:$0xff]   ;;  %vm2026_vm0 = vcmask 130048  }
  0x4b   :  { %2185 = vmatprep.mubr.bf16.mxu1 %v6105_v0  ;;  %v5270_v2 = vld [vmem:[#allocation5 + $0x784] ss:$20 sps:$4 sm:$0xff]   ;;  %2030 = vmatprep.subr.bf16.mxu0 %v5268_v1  ;;  %v5272_v3 = vld [vmem:[#allocation5] ss:$20 sps:$4 sm:$0xff]   ;;  %v5276_v6 = vld [vmem:[#allocation5 + $0x8] ss:$20 sps:$4 sm:$0xff]  }
  0x4c   :  { %v5273_v4 = vld [vmem:[#allocation5 + $0x780] ss:$20 sps:$4 sm:$0xff]   ;;  %2153 = vmatprep.subr.bf16.mxu1 %v5270_v2  ;;  %2031 = vmatpush1.bf16.msra.mxu0 %v5272_v3  ;;  %v5279_v8 = vld [vmem:[#allocation5 + $0x28] ss:$20 sps:$4 sm:$0xff]   ;;  %v5283_v11 = vld [vmem:[#allocation5 + $0x30] ss:$20 sps:$4 sm:$0xff]  }
  0x4d   :  { %v5274_v5 = vld [vmem:[#allocation5 + $0x2c] ss:$20 sps:$4 sm:$0xff]   ;;  %2154 = vmatpush1.bf16.msra.mxu1 %v5273_v4  ;;  %v5280_v9 = vld [vmem:[#allocation2 + $0x18] ss:$0 sps:$4 sm:$0xff]   ;;  %v5281_v10 = vld [vmem:[#allocation5 + $0x54] ss:$20 sps:$4 sm:$0xff]  }
  0x4e   :  { %v5278_v7 = vld [vmem:[#allocation5 + $0xc] ss:$20 sps:$4 sm:$0xff]   ;;  %2032 = vmatprep.subr.bf16.mxu0 %v5274_v5  ;;  %v5285_v12 = vld [vmem:[#allocation5 + $0x34] ss:$20 sps:$4 sm:$0xff]   ;;  %v5286_v13 = vld [vmem:[#allocation5 + $0x50] ss:$20 sps:$4 sm:$0xff]  }
  0x4f   :  { %2194 = vmatprep.subr.bf16.mxu1 %v5278_v7  ;;  %v5287_v14 = vld [vmem:[#allocation5 + $0x7c] ss:$20 sps:$4 sm:$0xff]   ;;  %v5289_v16 = vld [vmem:[#allocation5 + $0x58] ss:$20 sps:$4 sm:$0xff]   ;;  %v5295_v20 = vld [vmem:[#allocation5 + $0x80] ss:$20 sps:$4 sm:$0xff]  }
  0x50   :  { %4746 = vmatmul.mubr.msk.bf16.vlgmr.msra.gmra.mrb[0].mxu1 %vm2026_vm0, %v5280_v9  ;;  %2033 = vmatpush1.bf16.msra.mxu0 %v5279_v8  ;;  %v5291_v15 = vld [vmem:[#allocation5 + $0x5c] ss:$20 sps:$4 sm:$0xff]   ;;  %v5292_v17 = vld [vmem:[#allocation5 + $0x78] ss:$20 sps:$4 sm:$0xff]   ;;  %v5298_v21 = vld [vmem:[#allocation5 + $0xa0] ss:$20 sps:$4 sm:$0xff]  }
  0x51   :  { %2195 = vmatpush1.bf16.msra.mxu1 %v5276_v6  ;;  %2034 = vmatprep.subr.bf16.mxu0 %v5281_v10  ;;  %v5293_v18 = vld [vmem:[#allocation5 + $0xa4] ss:$20 sps:$4 sm:$0xff]   ;;  %v5299_v22 = vld [vmem:[#allocation5 + $0xcc] ss:$20 sps:$4 sm:$0xff]   ;;  %v5301_v24 = vld [vmem:[#allocation5 + $0xa8] ss:$20 sps:$4 sm:$0xff]  }
  0x52   :  { %2196 = vmatprep.subr.bf16.mxu1 %v5285_v12  ;;  %v5297_v19 = vld [vmem:[#allocation5 + $0x84] ss:$20 sps:$4 sm:$0xff]   ;;  %v5303_v23 = vld [vmem:[#allocation5 + $0xac] ss:$20 sps:$4 sm:$0xff]   ;;  %v5304_v25 = vld [vmem:[#allocation5 + $0xc8] ss:$20 sps:$4 sm:$0xff]  }
  0x53   :  { %v5305_v26 = vld [vmem:[#allocation5 + $0xf4] ss:$20 sps:$4 sm:$0xff]   ;;  %v5307_v28 = vld [vmem:[#allocation5 + $0xd0] ss:$20 sps:$4 sm:$0xff]   ;;  %v5313_v32 = vld [vmem:[#allocation5 + $0xf8] ss:$20 sps:$4 sm:$0xff]  }
  0x54   :  { %2035 = vmatpush1.bf16.msra.mxu0 %v5286_v13  ;;  %v5309_v27 = vld [vmem:[#allocation5 + $0xd4] ss:$20 sps:$4 sm:$0xff]   ;;  %v5310_v29 = vld [vmem:[#allocation5 + $0xf0] ss:$20 sps:$4 sm:$0xff]   ;;  %v5316_v33 = vld [vmem:[#allocation5 + $0x118] ss:$20 sps:$4 sm:$0xff]  }
  0x55   :  { %2197 = vmatpush1.bf16.msra.mxu1 %v5283_v11  ;;  %2036 = vmatprep.subr.bf16.mxu0 %v5287_v14  ;;  %v5311_v30 = vld [vmem:[#allocation5 + $0x11c] ss:$20 sps:$4 sm:$0xff]   ;;  %v5317_v34 = vld [vmem:[#allocation5 + $0x144] ss:$20 sps:$4 sm:$0xff]   ;;  %v5319_v36 = vld [vmem:[#allocation5 + $0x120] ss:$20 sps:$4 sm:$0xff]  }
  0x56   :  { %2198 = vmatprep.subr.bf16.mxu1 %v5291_v15  ;;  %v5315_v31 = vld [vmem:[#allocation5 + $0xfc] ss:$20 sps:$4 sm:$0xff]   ;;  %v5321_v35 = vld [vmem:[#allocation5 + $0x124] ss:$20 sps:$4 sm:$0xff]   ;;  %v5322_v37 = vld [vmem:[#allocation5 + $0x140] ss:$20 sps:$4 sm:$0xff]  }
  0x57   :  { %v5323_v38 = vld [vmem:[#allocation5 + $0x16c] ss:$20 sps:$4 sm:$0xff]   ;;  %v5325_v40 = vld [vmem:[#allocation5 + $0x148] ss:$20 sps:$4 sm:$0xff]   ;;  %v5331_v44 = vld [vmem:[#allocation5 + $0x170] ss:$20 sps:$4 sm:$0xff]  }
  0x58   :  { %2037 = vmatpush1.bf16.msra.mxu0 %v5292_v17  ;;  %v5327_v39 = vld [vmem:[#allocation5 + $0x14c] ss:$20 sps:$4 sm:$0xff]   ;;  %v5328_v41 = vld [vmem:[#allocation5 + $0x168] ss:$20 sps:$4 sm:$0xff]   ;;  %v5334_v45 = vld [vmem:[#allocation5 + $0x190] ss:$20 sps:$4 sm:$0xff]  }
  0x59   :  { %2199 = vmatpush1.bf16.msra.mxu1 %v5289_v16  ;;  %2038 = vmatprep.subr.bf16.mxu0 %v5293_v18  ;;  %v5329_v42 = vld [vmem:[#allocation5 + $0x194] ss:$20 sps:$4 sm:$0xff]   ;;  %v5335_v46 = vld [vmem:[#allocation5 + $0x1bc] ss:$20 sps:$4 sm:$0xff]   ;;  %v5337_v48 = vld [vmem:[#allocation5 + $0x198] ss:$20 sps:$4 sm:$0xff]  }
  0x5a   :  { %2200 = vmatprep.subr.bf16.mxu1 %v5297_v19  ;;  %v5333_v43 = vld [vmem:[#allocation5 + $0x174] ss:$20 sps:$4 sm:$0xff]   ;;  %v5339_v47 = vld [vmem:[#allocation5 + $0x19c] ss:$20 sps:$4 sm:$0xff]   ;;  %v5340_v50 = vld [vmem:[#allocation5 + $0x1b8] ss:$20 sps:$4 sm:$0xff]  }
  0x5b   :  { %v698_v49 = vld [vmem:[#allocation2] sm:$0xff]  ;;  %v5343_v54 = vld [vmem:[#allocation5 + $0x1c0] ss:$20 sps:$4 sm:$0xff]   ;;  %v5359_v1 = vld [vmem:[#allocation5 + $0x25c] ss:$20 sps:$4 sm:$0xff]   ;;  %vm6107_vm1 = vmmov 0  }
  0x5c   :  { %2039 = vmatpush1.bf16.msra.mxu0 %v5298_v21  ;;  %v5341_v51 = vld [vmem:[#allocation5 + $0x1e4] ss:$20 sps:$4 sm:$0xff]   ;;  %v6205_v52 = vcombine.high %v698_v49, %v698_v49  ;;  %v5346_v55 = vld [vmem:[#allocation5 + $0x1e0] ss:$20 sps:$4 sm:$0xff]   ;;  %v5349_v58 = vld [vmem:[#allocation5 + $0x1e8] ss:$20 sps:$4 sm:$0xff]   ;;  %v6209_v8 = vcombine.low %v698_v49, %v698_v49 }
  0x5d   :  { %2201 = vmatpush1.bf16.msra.mxu1 %v5295_v20  ;;  %2040 = vmatprep.subr.bf16.mxu0 %v5299_v22  ;;  %v5345_v53 = vld [vmem:[#allocation5 + $0x1c4] ss:$20 sps:$4 sm:$0xff]   ;;  %v5347_v56 = vld [vmem:[#allocation5 + $0x20c] ss:$20 sps:$4 sm:$0xff]   ;;  %v5352_v59 = vld [vmem:[#allocation5 + $0x208] ss:$20 sps:$4 sm:$0xff]  }
  0x5e   :  { %2202 = vmatprep.subr.bf16.mxu1 %v5303_v23  ;;  %2062 = vmatprep.mubr.bf16.mxu0 %v6205_v52  ;;  %v5351_v57 = vld [vmem:[#allocation5 + $0x1ec] ss:$20 sps:$4 sm:$0xff]   ;;  %v5353_v60 = vld [vmem:[#allocation5 + $0x234] ss:$20 sps:$4 sm:$0xff]   ;;  %v5355_v62 = vld [vmem:[#allocation5 + $0x210] ss:$20 sps:$4 sm:$0xff]  }
  0x5f   :  { %2226 = vmatprep.mubr.bf16.mxu1 %v6205_v52  ;;  %v5357_v61 = vld [vmem:[#allocation5 + $0x214] ss:$20 sps:$4 sm:$0xff]   ;;  %v5358_v63 = vld [vmem:[#allocation5 + $0x230] ss:$20 sps:$4 sm:$0xff]   ;;  %v5361_v3 = vld [vmem:[#allocation5 + $0x238] ss:$20 sps:$4 sm:$0xff]  }
  0x60   :  { %2041 = vmatpush1.bf16.msra.mxu0 %v5304_v25  ;;  %v5363_v2 = vld [vmem:[#allocation5 + $0x23c] ss:$20 sps:$4 sm:$0xff]   ;;  %v5364_v4 = vld [vmem:[#allocation5 + $0x258] ss:$20 sps:$4 sm:$0xff]   ;;  %v5366_v7 = vld [vmem:[#allocation5 + $0x280] ss:$20 sps:$4 sm:$0xff]  }
  0x61   :  { %2203 = vmatpush1.bf16.msra.mxu1 %v5301_v24  ;;  %2042 = vmatprep.subr.bf16.mxu0 %v5305_v26  ;;  %v5368_v5 = vld [vmem:[#allocation5 + $0x284] ss:$20 sps:$4 sm:$0xff]   ;;  %v5369_v9 = vld [vmem:[#allocation5 + $0x260] ss:$20 sps:$4 sm:$0xff]   ;;  %v5373_v12 = vld [vmem:[#allocation5 + $0x2a8] ss:$20 sps:$4 sm:$0xff]  }
  0x62   :  { %2204 = vmatprep.subr.bf16.mxu1 %v5309_v27  ;;  %v5371_v6 = vld [vmem:[#allocation5 + $0x264] ss:$20 sps:$4 sm:$0xff]   ;;  %v5375_v10 = vld [vmem:[#allocation5 + $0x2ac] ss:$20 sps:$4 sm:$0xff]   ;;  %v5376_v13 = vld [vmem:[#allocation5 + $0x288] ss:$20 sps:$4 sm:$0xff]  }
  0x63   :  { %v5378_v11 = vld [vmem:[#allocation5 + $0x28c] ss:$20 sps:$4 sm:$0xff]   ;;  %v5381_v14 = vld [vmem:[#allocation5 + $0x2d4] ss:$20 sps:$4 sm:$0xff]   ;;  %v5379_v16 = vld [vmem:[#allocation5 + $0x2d0] ss:$20 sps:$4 sm:$0xff]  }
  0x64   :  { %2043 = vmatpush1.bf16.msra.mxu0 %v5310_v29  ;;  %v5384_v15 = vld [vmem:[#allocation5 + $0x2b4] ss:$20 sps:$4 sm:$0xff]   ;;  %v5382_v17 = vld [vmem:[#allocation5 + $0x2b0] ss:$20 sps:$4 sm:$0xff]   ;;  %v5385_v20 = vld [vmem:[#allocation5 + $0x2f8] ss:$20 sps:$4 sm:$0xff]  }
  0x65   :  { %2205 = vmatpush1.bf16.msra.mxu1 %v5307_v28  ;;  %2044 = vmatprep.subr.bf16.mxu0 %v5311_v30  ;;  %v5387_v18 = vld [vmem:[#allocation5 + $0x2fc] ss:$20 sps:$4 sm:$0xff]   ;;  %v5388_v21 = vld [vmem:[#allocation5 + $0x2d8] ss:$20 sps:$4 sm:$0xff]   ;;  %v5391_v24 = vld [vmem:[#allocation5 + $0x320] ss:$20 sps:$4 sm:$0xff]  }
  0x66   :  { %2206 = vmatprep.subr.bf16.mxu1 %v5315_v31  ;;  %v5390_v19 = vld [vmem:[#allocation5 + $0x2dc] ss:$20 sps:$4 sm:$0xff]   ;;  %v5393_v22 = vld [vmem:[#allocation5 + $0x324] ss:$20 sps:$4 sm:$0xff]   ;;  %v5394_v25 = vld [vmem:[#allocation5 + $0x300] ss:$20 sps:$4 sm:$0xff]  }
  0x67   :  { %v5396_v23 = vld [vmem:[#allocation5 + $0x304] ss:$20 sps:$4 sm:$0xff]   ;;  %v5399_v26 = vld [vmem:[#allocation5 + $0x34c] ss:$20 sps:$4 sm:$0xff]   ;;  %v5397_v28 = vld [vmem:[#allocation5 + $0x348] ss:$20 sps:$4 sm:$0xff]  }
  0x68   :  { %2045 = vmatpush1.bf16.msra.mxu0 %v5316_v33  ;;  %v5402_v27 = vld [vmem:[#allocation5 + $0x32c] ss:$20 sps:$4 sm:$0xff]   ;;  %v5400_v29 = vld [vmem:[#allocation5 + $0x328] ss:$20 sps:$4 sm:$0xff]   ;;  %v5403_v33 = vld [vmem:[#allocation5 + $0x370] ss:$20 sps:$4 sm:$0xff]  }
  0x69   :  { %2207 = vmatpush1.bf16.msra.mxu1 %v5313_v32  ;;  %2046 = vmatprep.subr.bf16.mxu0 %v5317_v34  ;;  %v5405_v30 = vld [vmem:[#allocation5 + $0x374] ss:$20 sps:$4 sm:$0xff]   ;;  %v6213_v32 = vld [vmem:[#allocation2 + $0x8] sm:$0xff]  ;;  %s6108_s29 = smov [#allocation10]  }
  0x6a   :  { %2208 = vmatprep.subr.bf16.mxu1 %v5321_v35  ;;  %v5408_v31 = vld [vmem:[#allocation5 + $0x354] ss:$20 sps:$4 sm:$0xff]   ;;  %v5406_v34 = vld [vmem:[#allocation5 + $0x350] ss:$20 sps:$4 sm:$0xff]   ;;  %v6217_v35 = vcombine.high %v6213_v32, %v6213_v32  ;;  %s4483_s30 = sshll.u32 %s6108_s29, 4  ;;  %s4484_s30 = int_to_ptr.vmem [resolvable:$true] %s4483_s30 }
  0x6b   :  { %v5432_v49 = vld [vmem:[#allocation5 + $0x3f4] ss:$20 sps:$4 sm:$0xff]   ;;  %p6072_p5 = scmp.lt.s32.totalorder %s4484_s30, %s4484_s30 }
  0x6c   :  { %2047 = vmatpush1.bf16.msra.mxu0 %v5322_v37  ;;  %v5414_v37 = vld [vmem:[#allocation5 + $0x37c] ss:$20 sps:$4 sm:$0xff]  }
  0x6d   :  { %2209 = vmatpush1.bf16.msra.mxu1 %v5319_v36  ;;  %2048 = vmatprep.subr.bf16.mxu0 %v5323_v38  ;;  %v5411_v36 = vld [vmem:[#allocation5 + $0x39c] ss:$20 sps:$4 sm:$0xff]   ;;  %v5409_v38 = vld [vmem:[#allocation5 + $0x398] ss:$20 sps:$4 sm:$0xff]  }
  0x6e   :  { %2210 = vmatprep.subr.bf16.mxu1 %v5327_v39  ;;  %v5412_v39 = vld [vmem:[#allocation5 + $0x378] ss:$20 sps:$4 sm:$0xff]  }
  0x70   :  { %2049 = vmatpush1.bf16.msra.mxu0 %v5328_v41  ;;  %v5420_v41 = vld [vmem:[#allocation5 + $0x3a4] ss:$20 sps:$4 sm:$0xff]  }
  0x71   :  { %2211 = vmatpush1.bf16.msra.mxu1 %v5325_v40  ;;  %2050 = vmatprep.subr.bf16.mxu0 %v5329_v42  ;;  %v5417_v40 = vld [vmem:[#allocation5 + $0x3c4] ss:$20 sps:$4 sm:$0xff]   ;;  %v5415_v42 = vld [vmem:[#allocation5 + $0x3c0] ss:$20 sps:$4 sm:$0xff]  }
  0x72   :  { %2212 = vmatprep.subr.bf16.mxu1 %v5333_v43  ;;  %v5418_v43 = vld [vmem:[#allocation5 + $0x3a0] ss:$20 sps:$4 sm:$0xff]  }
  0x74   :  { %2051 = vmatpush1.bf16.msra.mxu0 %v5334_v45  ;;  %v5426_v45 = vld [vmem:[#allocation5 + $0x3cc] ss:$20 sps:$4 sm:$0xff]  }
  0x75   :  { %2213 = vmatpush1.bf16.msra.mxu1 %v5331_v44  ;;  %2052 = vmatprep.subr.bf16.mxu0 %v5335_v46  ;;  %v5423_v44 = vld [vmem:[#allocation5 + $0x3ec] ss:$20 sps:$4 sm:$0xff]   ;;  %v5421_v46 = vld [vmem:[#allocation5 + $0x3e8] ss:$20 sps:$4 sm:$0xff]  }
  0x76   :  { %2214 = vmatprep.subr.bf16.mxu1 %v5339_v47  ;;  %v5424_v47 = vld [vmem:[#allocation5 + $0x3c8] ss:$20 sps:$4 sm:$0xff]  }
  0x78   :  { %2053 = vmatpush1.bf16.msra.mxu0 %v5340_v50  ;;  %v5427_v50 = vld [vmem:[#allocation5 + $0x410] ss:$20 sps:$4 sm:$0xff]  }
  0x79   :  { %2215 = vmatpush1.bf16.msra.mxu1 %v5337_v48  ;;  %2054 = vmatprep.subr.bf16.mxu0 %v5341_v51  ;;  %v5429_v48 = vld [vmem:[#allocation5 + $0x414] ss:$20 sps:$4 sm:$0xff]   ;;  %v5430_v51 = vld [vmem:[#allocation5 + $0x3f0] ss:$20 sps:$4 sm:$0xff]  }
  0x7a   :  { %2216 = vmatprep.subr.bf16.mxu1 %v5345_v53  ;;  %v5435_v53 = vld [vmem:[#allocation5 + $0x43c] ss:$20 sps:$4 sm:$0xff]  }
  0x7c   :  { %2055 = vmatpush1.bf16.msra.mxu0 %v5346_v55  ;;  %v5433_v55 = vld [vmem:[#allocation5 + $0x438] ss:$20 sps:$4 sm:$0xff]  }
  0x7d   :  { %2217 = vmatpush1.bf16.msra.mxu1 %v5343_v54  ;;  %2056 = vmatprep.subr.bf16.mxu0 %v5347_v56  ;;  %v5438_v54 = vld [vmem:[#allocation5 + $0x41c] ss:$20 sps:$4 sm:$0xff]   ;;  %v5436_v56 = vld [vmem:[#allocation5 + $0x418] ss:$20 sps:$4 sm:$0xff]  }
  0x7e   :  { %2218 = vmatprep.subr.bf16.mxu1 %v5351_v57  ;;  %v5441_v57 = vld [vmem:[#allocation5 + $0x464] ss:$20 sps:$4 sm:$0xff]  }
  0x80   :  { %2057 = vmatpush1.bf16.msra.mxu0 %v5352_v59  ;;  %v5439_v59 = vld [vmem:[#allocation5 + $0x460] ss:$20 sps:$4 sm:$0xff]  }
  0x81   :  { %2219 = vmatpush1.bf16.msra.mxu1 %v5349_v58  ;;  %2058 = vmatprep.subr.bf16.mxu0 %v5353_v60  ;;  %v5444_v58 = vld [vmem:[#allocation5 + $0x444] ss:$20 sps:$4 sm:$0xff]   ;;  %v5442_v60 = vld [vmem:[#allocation5 + $0x440] ss:$20 sps:$4 sm:$0xff]  }
  0x82   :  { %2220 = vmatprep.subr.bf16.mxu1 %v5357_v61  ;;  %v5447_v61 = vld [vmem:[#allocation5 + $0x48c] ss:$20 sps:$4 sm:$0xff]  }
  0x84   :  { %2059 = vmatpush1.bf16.msra.mxu0 %v5358_v63  ;;  %v5445_v63 = vld [vmem:[#allocation5 + $0x488] ss:$20 sps:$4 sm:$0xff]  }
  0x85   :  { %2221 = vmatpush1.bf16.msra.mxu1 %v5355_v62  ;;  %2060 = vmatprep.subr.bf16.mxu0 %v5359_v1  ;;  %v5450_v62 = vld [vmem:[#allocation5 + $0x46c] ss:$20 sps:$4 sm:$0xff]   ;;  %v5448_v1 = vld [vmem:[#allocation5 + $0x468] ss:$20 sps:$4 sm:$0xff]  }
  0x86   :  { %2222 = vmatprep.subr.bf16.mxu1 %v5363_v2  ;;  %v5453_v2 = vld [vmem:[#allocation5 + $0x4b4] ss:$20 sps:$4 sm:$0xff]  }
  0x88   :  { %2061 = vmatpush1.bf16.msra.mxu0 %v5364_v4  ;;  %v5451_v4 = vld [vmem:[#allocation5 + $0x4b0] ss:$20 sps:$4 sm:$0xff]  }
  0x89   :  { %2223 = vmatpush1.bf16.msra.mxu1 %v5361_v3  ;;  %2071 = vmatprep.subr.bf16.mxu0 %v5368_v5  ;;  %v5456_v3 = vld [vmem:[#allocation5 + $0x494] ss:$20 sps:$4 sm:$0xff]   ;;  %v5454_v5 = vld [vmem:[#allocation5 + $0x490] ss:$20 sps:$4 sm:$0xff]  }
  0x8a   :  { %2224 = vmatprep.subr.bf16.mxu1 %v5371_v6  ;;  %v5459_v6 = vld [vmem:[#allocation5 + $0x4dc] ss:$20 sps:$4 sm:$0xff]  }
  0x8b   :  { %2063 = vmatmul.mubr.bf16.vlgmr.msra.gmra.mrb[0].mxu0 %v6209_v8 }
  0x8c   :  { %2072 = vmatpush1.bf16.msra.mxu0 %v5366_v7  ;;  %2103 = vmatprep.mubr.bf16.mxu0 %v6217_v35  ;;  %v5462_v7 = vld [vmem:[#allocation5 + $0x4bc] ss:$20 sps:$4 sm:$0xff]  }
  0x8d   :  { %2225 = vmatpush1.bf16.msra.mxu1 %v5369_v9  ;;  %2073 = vmatprep.subr.bf16.mxu0 %v5375_v10  ;;  %v5457_v9 = vld [vmem:[#allocation5 + $0x4d8] ss:$20 sps:$4 sm:$0xff]  }
  0x8e   :  { %2235 = vmatprep.subr.bf16.mxu1 %v5378_v11  ;;  %v5460_v10 = vld [vmem:[#allocation5 + $0x4b8] ss:$20 sps:$4 sm:$0xff]  }
  0x8f   :  { %v5467_v11 = vld [vmem:[#allocation5 + $0x504] ss:$20 sps:$4 sm:$0xff]  }
  0x90   :  { %2227 = vmatmul.mubr.bf16.vlgmr.msra.gmra.mrb[4].mxu1 %v6209_v8  ;;  %2074 = vmatpush1.bf16.msra.mxu0 %v5373_v12  ;;  %v5470_v12 = vld [vmem:[#allocation5 + $0x4e4] ss:$20 sps:$4 sm:$0xff]  }
  0x91   :  { %2236 = vmatpush1.bf16.msra.mxu1 %v5376_v13  ;;  %2075 = vmatprep.subr.bf16.mxu0 %v5381_v14  ;;  %v6223_v13 = vcombine.low %v6213_v32, %v6213_v32  ;;  %v5465_v14 = vld [vmem:[#allocation5 + $0x500] ss:$20 sps:$4 sm:$0xff]  }
  0x92   :  { %2237 = vmatprep.subr.bf16.mxu1 %v5384_v15  ;;  %2267 = vmatprep.mubr.bf16.mxu1 %v6217_v35  ;;  %v5468_v15 = vld [vmem:[#allocation5 + $0x4e0] ss:$20 sps:$4 sm:$0xff]  }
  0x93   :  { %v5489_v32 = vld [vmem:[#allocation5 + $0x5a0] ss:$20 sps:$4 sm:$0xff]  }
  0x94   :  { %2076 = vmatpush1.bf16.msra.mxu0 %v5379_v16  ;;  %v5473_v16 = vld [vmem:[#allocation5 + $0x52c] ss:$20 sps:$4 sm:$0xff]  }
  0x95   :  { %2238 = vmatpush1.bf16.msra.mxu1 %v5382_v17  ;;  %2077 = vmatprep.subr.bf16.mxu0 %v5387_v18  ;;  %v5476_v17 = vld [vmem:[#allocation5 + $0x50c] ss:$20 sps:$4 sm:$0xff]   ;;  %v6225_v18 = vld [vmem:[#allocation2 + $0x10] sm:$0xff] }
  0x96   :  { %2239 = vmatprep.subr.bf16.mxu1 %v5390_v19  ;;  %v5471_v19 = vld [vmem:[#allocation5 + $0x528] ss:$20 sps:$4 sm:$0xff]  }
  0x98   :  { %2078 = vmatpush1.bf16.msra.mxu0 %v5385_v20  ;;  %v6229_v20 = vcombine.high %v6225_v18, %v6225_v18 }
  0x99   :  { %2240 = vmatpush1.bf16.msra.mxu1 %v5388_v21  ;;  %2079 = vmatprep.subr.bf16.mxu0 %v5393_v22  ;;  %v5474_v21 = vld [vmem:[#allocation5 + $0x508] ss:$20 sps:$4 sm:$0xff]  }
  0x9a   :  { %2241 = vmatprep.subr.bf16.mxu1 %v5396_v23  ;;  %v5479_v22 = vld [vmem:[#allocation5 + $0x554] ss:$20 sps:$4 sm:$0xff]  }
  0x9b   :  { %v5482_v23 = vld [vmem:[#allocation5 + $0x534] ss:$20 sps:$4 sm:$0xff]  }
  0x9c   :  { %2080 = vmatpush1.bf16.msra.mxu0 %v5391_v24  ;;  %v5477_v24 = vld [vmem:[#allocation5 + $0x550] ss:$20 sps:$4 sm:$0xff]  }
  0x9d   :  { %2242 = vmatpush1.bf16.msra.mxu1 %v5394_v25  ;;  %2081 = vmatprep.subr.bf16.mxu0 %v5399_v26  ;;  %v5480_v25 = vld [vmem:[#allocation5 + $0x530] ss:$20 sps:$4 sm:$0xff]  }
  0x9e   :  { %2243 = vmatprep.subr.bf16.mxu1 %v5402_v27  ;;  %v5485_v26 = vld [vmem:[#allocation5 + $0x57c] ss:$20 sps:$4 sm:$0xff]  }
  0x9f   :  { %v5488_v27 = vld [vmem:[#allocation5 + $0x55c] ss:$20 sps:$4 sm:$0xff]  }
  0xa0   :  { %2082 = vmatpush1.bf16.msra.mxu0 %v5397_v28  ;;  %v5483_v28 = vld [vmem:[#allocation5 + $0x578] ss:$20 sps:$4 sm:$0xff]  }
  0xa1   :  { %2244 = vmatpush1.bf16.msra.mxu1 %v5400_v29  ;;  %2083 = vmatprep.subr.bf16.mxu0 %v5405_v30  ;;  %v5486_v29 = vld [vmem:[#allocation5 + $0x558] ss:$20 sps:$4 sm:$0xff]  }
  0xa2   :  { %2245 = vmatprep.subr.bf16.mxu1 %v5408_v31  ;;  %v5491_v30 = vld [vmem:[#allocation5 + $0x5a4] ss:$20 sps:$4 sm:$0xff]  }
  0xa3   :  { %v5494_v31 = vld [vmem:[#allocation5 + $0x584] ss:$20 sps:$4 sm:$0xff]  }
  0xa4   :  { %2084 = vmatpush1.bf16.msra.mxu0 %v5403_v33  ;;  %v5492_v33 = vld [vmem:[#allocation5 + $0x580] ss:$20 sps:$4 sm:$0xff]  }
  0xa5   :  { %2246 = vmatpush1.bf16.msra.mxu1 %v5406_v34  ;;  %2085 = vmatprep.subr.bf16.mxu0 %v5411_v36  ;;  %v5497_v34 = vld [vmem:[#allocation5 + $0x5cc] ss:$20 sps:$4 sm:$0xff]  }
  0xa6   :  { %2247 = vmatprep.subr.bf16.mxu1 %v5414_v37  ;;  %v5500_v36 = vld [vmem:[#allocation5 + $0x5ac] ss:$20 sps:$4 sm:$0xff]   ;;  %v5495_v37 = vld [vmem:[#allocation5 + $0x5c8] ss:$20 sps:$4 sm:$0xff]  }
  0xa8   :  { %2086 = vmatpush1.bf16.msra.mxu0 %v5409_v38  ;;  %v5498_v38 = vld [vmem:[#allocation5 + $0x5a8] ss:$20 sps:$4 sm:$0xff]  }
  0xa9   :  { %2248 = vmatpush1.bf16.msra.mxu1 %v5412_v39  ;;  %2087 = vmatprep.subr.bf16.mxu0 %v5417_v40  ;;  %v5503_v39 = vld [vmem:[#allocation5 + $0x5f4] ss:$20 sps:$4 sm:$0xff]  }
  0xaa   :  { %2249 = vmatprep.subr.bf16.mxu1 %v5420_v41  ;;  %v5506_v40 = vld [vmem:[#allocation5 + $0x5d4] ss:$20 sps:$4 sm:$0xff]   ;;  %v5501_v41 = vld [vmem:[#allocation5 + $0x5f0] ss:$20 sps:$4 sm:$0xff]  }
  0xac   :  { %2088 = vmatpush1.bf16.msra.mxu0 %v5415_v42  ;;  %v5504_v42 = vld [vmem:[#allocation5 + $0x5d0] ss:$20 sps:$4 sm:$0xff]  }
  0xad   :  { %2250 = vmatpush1.bf16.msra.mxu1 %v5418_v43  ;;  %2089 = vmatprep.subr.bf16.mxu0 %v5423_v44  ;;  %v5509_v43 = vld [vmem:[#allocation5 + $0x61c] ss:$20 sps:$4 sm:$0xff]  }
  0xae   :  { %2251 = vmatprep.subr.bf16.mxu1 %v5426_v45  ;;  %v5512_v44 = vld [vmem:[#allocation5 + $0x5fc] ss:$20 sps:$4 sm:$0xff]   ;;  %v5507_v45 = vld [vmem:[#allocation5 + $0x618] ss:$20 sps:$4 sm:$0xff]  }
  0xb0   :  { %2090 = vmatpush1.bf16.msra.mxu0 %v5421_v46  ;;  %v5510_v46 = vld [vmem:[#allocation5 + $0x5f8] ss:$20 sps:$4 sm:$0xff]  }
  0xb1   :  { %2252 = vmatpush1.bf16.msra.mxu1 %v5424_v47  ;;  %2091 = vmatprep.subr.bf16.mxu0 %v5429_v48  ;;  %v5515_v47 = vld [vmem:[#allocation5 + $0x644] ss:$20 sps:$4 sm:$0xff]  }
  0xb2   :  { %2253 = vmatprep.subr.bf16.mxu1 %v5432_v49  ;;  %v5518_v48 = vld [vmem:[#allocation5 + $0x624] ss:$20 sps:$4 sm:$0xff]   ;;  %v5513_v49 = vld [vmem:[#allocation5 + $0x640] ss:$20 sps:$4 sm:$0xff]  }
  0xb4   :  { %2092 = vmatpush1.bf16.msra.mxu0 %v5427_v50  ;;  %v5516_v50 = vld [vmem:[#allocation5 + $0x620] ss:$20 sps:$4 sm:$0xff]  }
  0xb5   :  { %2254 = vmatpush1.bf16.msra.mxu1 %v5430_v51  ;;  %2093 = vmatprep.subr.bf16.mxu0 %v5435_v53  ;;  %v5521_v51 = vld [vmem:[#allocation5 + $0x66c] ss:$20 sps:$4 sm:$0xff]  }
  0xb6   :  { %2255 = vmatprep.subr.bf16.mxu1 %v5438_v54  ;;  %v5524_v53 = vld [vmem:[#allocation5 + $0x64c] ss:$20 sps:$4 sm:$0xff]   ;;  %v5519_v54 = vld [vmem:[#allocation5 + $0x668] ss:$20 sps:$4 sm:$0xff]  }
  0xb8   :  { %2094 = vmatpush1.bf16.msra.mxu0 %v5433_v55  ;;  %v5522_v55 = vld [vmem:[#allocation5 + $0x648] ss:$20 sps:$4 sm:$0xff]  }
  0xb9   :  { %2256 = vmatpush1.bf16.msra.mxu1 %v5436_v56  ;;  %2095 = vmatprep.subr.bf16.mxu0 %v5441_v57  ;;  %v5527_v56 = vld [vmem:[#allocation5 + $0x694] ss:$20 sps:$4 sm:$0xff]  }
  0xba   :  { %2257 = vmatprep.subr.bf16.mxu1 %v5444_v58  ;;  %v5530_v57 = vld [vmem:[#allocation5 + $0x674] ss:$20 sps:$4 sm:$0xff]   ;;  %v5525_v58 = vld [vmem:[#allocation5 + $0x690] ss:$20 sps:$4 sm:$0xff]  }
  0xbc   :  { %2096 = vmatpush1.bf16.msra.mxu0 %v5439_v59  ;;  %v5528_v59 = vld [vmem:[#allocation5 + $0x670] ss:$20 sps:$4 sm:$0xff]  }
  0xbd   :  { %2258 = vmatpush1.bf16.msra.mxu1 %v5442_v60  ;;  %2097 = vmatprep.subr.bf16.mxu0 %v5447_v61  ;;  %v5533_v60 = vld [vmem:[#allocation5 + $0x6bc] ss:$20 sps:$4 sm:$0xff]  }
  0xbe   :  { %2259 = vmatprep.subr.bf16.mxu1 %v5450_v62  ;;  %v5536_v61 = vld [vmem:[#allocation5 + $0x69c] ss:$20 sps:$4 sm:$0xff]   ;;  %v5531_v62 = vld [vmem:[#allocation5 + $0x6b8] ss:$20 sps:$4 sm:$0xff]  }
  0xc0   :  { %2098 = vmatpush1.bf16.msra.mxu0 %v5445_v63  ;;  %v5534_v63 = vld [vmem:[#allocation5 + $0x698] ss:$20 sps:$4 sm:$0xff]  }
  0xc1   :  { %2260 = vmatpush1.bf16.msra.mxu1 %v5448_v1  ;;  %2099 = vmatprep.subr.bf16.mxu0 %v5453_v2  ;;  %v5539_v1 = vld [vmem:[#allocation5 + $0x6e4] ss:$20 sps:$4 sm:$0xff]  }
  0xc2   :  { %2261 = vmatprep.subr.bf16.mxu1 %v5456_v3  ;;  %v5542_v2 = vld [vmem:[#allocation5 + $0x6c4] ss:$20 sps:$4 sm:$0xff]   ;;  %v5537_v3 = vld [vmem:[#allocation5 + $0x6e0] ss:$20 sps:$4 sm:$0xff]  }
  0xc4   :  { %2100 = vmatpush1.bf16.msra.mxu0 %v5451_v4  ;;  %v5540_v4 = vld [vmem:[#allocation5 + $0x6c0] ss:$20 sps:$4 sm:$0xff]  }
  0xc5   :  { %2262 = vmatpush1.bf16.msra.mxu1 %v5454_v5  ;;  %2101 = vmatprep.subr.bf16.mxu0 %v5459_v6  ;;  %v5545_v5 = vld [vmem:[#allocation5 + $0x70c] ss:$20 sps:$4 sm:$0xff]  }
  0xc6   :  { %2263 = vmatprep.subr.bf16.mxu1 %v5462_v7  ;;  %v5548_v6 = vld [vmem:[#allocation5 + $0x6ec] ss:$20 sps:$4 sm:$0xff]   ;;  %v5543_v7 = vld [vmem:[#allocation5 + $0x708] ss:$20 sps:$4 sm:$0xff]  }
  0xc8   :  { %2102 = vmatpush1.bf16.msra.mxu0 %v5457_v9  ;;  %v5546_v9 = vld [vmem:[#allocation5 + $0x6e8] ss:$20 sps:$4 sm:$0xff]  }
  0xc9   :  { %2264 = vmatpush1.bf16.msra.mxu1 %v5460_v10  ;;  %2112 = vmatprep.subr.bf16.mxu0 %v5467_v11  ;;  %v5551_v10 = vld [vmem:[#allocation5 + $0x734] ss:$20 sps:$4 sm:$0xff]  }
  0xca   :  { %2265 = vmatprep.subr.bf16.mxu1 %v5470_v12  ;;  %v5554_v11 = vld [vmem:[#allocation5 + $0x714] ss:$20 sps:$4 sm:$0xff]   ;;  %v5549_v12 = vld [vmem:[#allocation5 + $0x730] ss:$20 sps:$4 sm:$0xff]  }
  0xcb   :  { %2104 = vmatmul.mubr.bf16.vlgmr.msra.gmra.mrb[0].mxu0 %v6223_v13 }
  0xcc   :  { %2113 = vmatpush1.bf16.msra.mxu0 %v5465_v14  ;;  %2144 = vmatprep.mubr.bf16.mxu0 %v6229_v20  ;;  %v5552_v14 = vld [vmem:[#allocation5 + $0x710] ss:$20 sps:$4 sm:$0xff]  }
  0xcd   :  { %2266 = vmatpush1.bf16.msra.mxu1 %v5468_v15  ;;  %2114 = vmatprep.subr.bf16.mxu0 %v5473_v16  ;;  %v5557_v15 = vld [vmem:[#allocation5 + $0x75c] ss:$20 sps:$4 sm:$0xff]  }
  0xce   :  { %2276 = vmatprep.subr.bf16.mxu1 %v5476_v17  ;;  %v5560_v16 = vld [vmem:[#allocation5 + $0x73c] ss:$20 sps:$4 sm:$0xff]   ;;  %v5555_v17 = vld [vmem:[#allocation5 + $0x758] ss:$20 sps:$4 sm:$0xff]  }
  0xd0   :  { %2268 = vmatmul.mubr.bf16.vlgmr.msra.gmra.mrb[4].mxu1 %v6223_v13  ;;  %2115 = vmatpush1.bf16.msra.mxu0 %v5471_v19  ;;  %v5558_v19 = vld [vmem:[#allocation5 + $0x738] ss:$20 sps:$4 sm:$0xff]  }
  0xd1   :  { %2277 = vmatpush1.bf16.msra.mxu1 %v5474_v21  ;;  %2116 = vmatprep.subr.bf16.mxu0 %v5479_v22  ;;  %v5565_v21 = vld [vmem:[#allocation5 + $0x764] ss:$20 sps:$4 sm:$0xff]  }
  0xd2   :  { %2278 = vmatprep.subr.bf16.mxu1 %v5482_v23  ;;  %2308 = vmatprep.mubr.bf16.mxu1 %v6229_v20  ;;  %v5566_v22 = vld [vmem:[#allocation5 + $0x150] ss:$20 sps:$4 sm:$0xff]   ;;  %v6237_v23 = vcombine.low %v6225_v18, %v6225_v18  ;;  %v5571_v18 = vld [vmem:[#allocation5 + $0x60] ss:$20 sps:$4 sm:$0xff]  }
  0xd4   :  { %2117 = vmatpush1.bf16.msra.mxu0 %v5477_v24  ;;  %v5563_v24 = vld [vmem:[#allocation5 + $0x760] ss:$20 sps:$4 sm:$0xff]  }
  0xd5   :  { %2279 = vmatpush1.bf16.msra.mxu1 %v5480_v25  ;;  %2118 = vmatprep.subr.bf16.mxu0 %v5485_v26  ;;  %v5567_v25 = vld [vmem:[#allocation5 + $0x10] ss:$20 sps:$4 sm:$0xff]   ;;  %v5568_v26 = vld [vmem:[#allocation5 + $0x178] ss:$20 sps:$4 sm:$0xff]  }
  0xd6   :  { %2280 = vmatprep.subr.bf16.mxu1 %v5488_v27  ;;  %v5574_v27 = vld [vmem:[#allocation5 + $0x78c] ss:$20 sps:$4 sm:$0xff]  }
  0xd8   :  { %2119 = vmatpush1.bf16.msra.mxu0 %v5483_v28  ;;  %v5569_v28 = vld [vmem:[#allocation5 + $0x38] ss:$20 sps:$4 sm:$0xff]  }
  0xd9   :  { %2281 = vmatpush1.bf16.msra.mxu1 %v5486_v29  ;;  %2120 = vmatprep.subr.bf16.mxu0 %v5491_v30  ;;  %v5572_v29 = vld [vmem:[#allocation5 + $0x788] ss:$20 sps:$4 sm:$0xff]   ;;  %v5570_v30 = vld [vmem:[#allocation5 + $0x1a0] ss:$20 sps:$4 sm:$0xff]  }
  0xda   :  { %2282 = vmatprep.subr.bf16.mxu1 %v5494_v31  ;;  %v5585_v31 = vld [vmem:[#allocation5 + $0x3d0] ss:$20 sps:$4 sm:$0xff]  }
  0xdc   :  { %2121 = vmatpush1.bf16.msra.mxu0 %v5489_v32  ;;  %v5575_v32 = vld [vmem:[#allocation5 + $0x1c8] ss:$20 sps:$4 sm:$0xff]  }
  0xdd   :  { %2283 = vmatpush1.bf16.msra.mxu1 %v5492_v33  ;;  %2122 = vmatprep.subr.bf16.mxu0 %v5497_v34  ;;  %v5576_v33 = vld [vmem:[#allocation5 + $0x88] ss:$20 sps:$4 sm:$0xff]   ;;  %v5577_v34 = vld [vmem:[#allocation5 + $0x1f0] ss:$20 sps:$4 sm:$0xff]  }
  0xde   :  { %2284 = vmatprep.subr.bf16.mxu1 %v5500_v36  ;;  %v5578_v36 = vld [vmem:[#allocation5 + $0xb0] ss:$20 sps:$4 sm:$0xff]  }
  0xe0   :  { %2123 = vmatpush1.bf16.msra.mxu0 %v5495_v37  ;;  %v5586_v37 = vld [vmem:[#allocation5 + $0x290] ss:$20 sps:$4 sm:$0xff]  }
  0xe1   :  { %2285 = vmatpush1.bf16.msra.mxu1 %v5498_v38  ;;  %2124 = vmatprep.subr.bf16.mxu0 %v5503_v39  ;;  %v5579_v38 = vld [vmem:[#allocation5 + $0x218] ss:$20 sps:$4 sm:$0xff]  }
  0xe2   :  { %2286 = vmatprep.subr.bf16.mxu1 %v5506_v40  ;;  %v5588_v39 = vld [vmem:[#allocation5 + $0x3f8] ss:$20 sps:$4 sm:$0xff]  }
  0xe3   :  { %v5590_v40 = vld [vmem:[#allocation5 + $0x2b8] ss:$20 sps:$4 sm:$0xff]  }
  0xe4   :  { %2125 = vmatpush1.bf16.msra.mxu0 %v5501_v41  ;;  %v6243_v41 = vld [vmem:[#allocation2 + $0x18] ss:$0 sps:$4 sm:$0xff]  }
  0xe5   :  { %2287 = vmatpush1.bf16.msra.mxu1 %v5504_v42  ;;  %2126 = vmatprep.subr.bf16.mxu0 %v5509_v43  ;;  %v5581_v42 = vld [vmem:[#allocation5 + $0x240] ss:$20 sps:$4 sm:$0xff]  }
  0xe6   :  { %2288 = vmatprep.subr.bf16.mxu1 %v5512_v44  ;;  %v5592_v43 = vld [vmem:[#allocation5 + $0x420] ss:$20 sps:$4 sm:$0xff]  }
  0xe7   :  { %v5582_v44 = vld [vmem:[#allocation5 + $0x100] ss:$20 sps:$4 sm:$0xff]  }
  0xe8   :  { %2127 = vmatpush1.bf16.msra.mxu0 %v5507_v45  ;;  %v5594_v45 = vld [vmem:[#allocation5 + $0x2e0] ss:$20 sps:$4 sm:$0xff]  }
  0xe9   :  { %2289 = vmatpush1.bf16.msra.mxu1 %v5510_v46  ;;  %2128 = vmatprep.subr.bf16.mxu0 %v5515_v47  ;;  %v5583_v46 = vld [vmem:[#allocation5 + $0x268] ss:$20 sps:$4 sm:$0xff]  }
  0xea   :  { %2290 = vmatprep.subr.bf16.mxu1 %v5518_v48  ;;  %v5596_v47 = vld [vmem:[#allocation5 + $0x448] ss:$20 sps:$4 sm:$0xff]  }
  0xeb   :  { %v5584_v48 = vld [vmem:[#allocation5 + $0x128] ss:$20 sps:$4 sm:$0xff]  }
  0xec   :  { %2129 = vmatpush1.bf16.msra.mxu0 %v5513_v49  ;;  %v5598_v49 = vld [vmem:[#allocation5 + $0x308] ss:$20 sps:$4 sm:$0xff]  }
  0xed   :  { %2291 = vmatpush1.bf16.msra.mxu1 %v5516_v50  ;;  %2130 = vmatprep.subr.bf16.mxu0 %v5521_v51  ;;  %v5587_v51 = vld [vmem:[#allocation5 + $0x650] ss:$20 sps:$4 sm:$0xff]  }
  0xee   :  { %2292 = vmatprep.subr.bf16.mxu1 %v5524_v53  ;;  %v5600_v53 = vld [vmem:[#allocation5 + $0x470] ss:$20 sps:$4 sm:$0xff]  }
  0xf0   :  { %2131 = vmatpush1.bf16.msra.mxu0 %v5519_v54 }
  0xf1   :  { %2293 = vmatpush1.bf16.msra.mxu1 %v5522_v55  ;;  %2132 = vmatprep.subr.bf16.mxu0 %v5527_v56  ;;  %v5589_v56 = vld [vmem:[#allocation5 + $0x510] ss:$20 sps:$4 sm:$0xff]  }
  0xf2   :  { %2294 = vmatprep.subr.bf16.mxu1 %v5530_v57  ;;  %v5602_v57 = vld [vmem:[#allocation5 + $0x330] ss:$20 sps:$4 sm:$0xff]  }
  0xf4   :  { %2133 = vmatpush1.bf16.msra.mxu0 %v5525_v58  ;;  %v5591_v58 = vld [vmem:[#allocation5 + $0x678] ss:$20 sps:$4 sm:$0xff]  }
  0xf5   :  { %2295 = vmatpush1.bf16.msra.mxu1 %v5528_v59  ;;  %2134 = vmatprep.subr.bf16.mxu0 %v5533_v60  ;;  %v5604_v59 = vld [vmem:[#allocation5 + $0x498] ss:$20 sps:$4 sm:$0xff]  }
  0xf6   :  { %2296 = vmatprep.subr.bf16.mxu1 %v5536_v61  ;;  %v5593_v60 = vld [vmem:[#allocation5 + $0x538] ss:$20 sps:$4 sm:$0xff]  }
  0xf7   :  { %v5606_v61 = vld [vmem:[#allocation5 + $0x358] ss:$20 sps:$4 sm:$0xff]  }
  0xf8   :  { %2135 = vmatpush1.bf16.msra.mxu0 %v5531_v62  ;;  %v5595_v62 = vld [vmem:[#allocation5 + $0x6a0] ss:$20 sps:$4 sm:$0xff]  }
  0xf9   :  { %2297 = vmatpush1.bf16.msra.mxu1 %v5534_v63  ;;  %2136 = vmatprep.subr.bf16.mxu0 %v5539_v1  ;;  %v5608_v63 = vld [vmem:[#allocation5 + $0x4c0] ss:$20 sps:$4 sm:$0xff]  }
  0xfa   :  { %2298 = vmatprep.subr.bf16.mxu1 %v5542_v2  ;;  %v5597_v1 = vld [vmem:[#allocation5 + $0x560] ss:$20 sps:$4 sm:$0xff]  }
  0xfb   :  { %v5610_v2 = vld [vmem:[#allocation5 + $0x380] ss:$20 sps:$4 sm:$0xff]  }
  0xfc   :  { %2137 = vmatpush1.bf16.msra.mxu0 %v5537_v3  ;;  %v5599_v3 = vld [vmem:[#allocation5 + $0x6c8] ss:$20 sps:$4 sm:$0xff]  }
  0xfd   :  { %2299 = vmatpush1.bf16.msra.mxu1 %v5540_v4  ;;  %2138 = vmatprep.subr.bf16.mxu0 %v5545_v5  ;;  %v5612_v4 = vld [vmem:[#allocation5 + $0x4e8] ss:$20 sps:$4 sm:$0xff]  }
  0xfe   :  { %2300 = vmatprep.subr.bf16.mxu1 %v5548_v6  ;;  %v5601_v5 = vld [vmem:[#allocation5 + $0x588] ss:$20 sps:$4 sm:$0xff]  }
  0xff   :  { %v5614_v6 = vld [vmem:[#allocation5 + $0x3a8] ss:$20 sps:$4 sm:$0xff]  }
 0x100   :  { %2139 = vmatpush1.bf16.msra.mxu0 %v5543_v7  ;;  %v5603_v7 = vld [vmem:[#allocation5 + $0x6f0] ss:$20 sps:$4 sm:$0xff]  }
 0x101   :  { %2301 = vmatpush1.bf16.msra.mxu1 %v5546_v9  ;;  %2140 = vmatprep.subr.bf16.mxu0 %v5551_v10  ;;  %v5617_v9 = vld [vmem:[#allocation5 + $0x790] ss:$20 sps:$4 sm:$0xff]   ;;  %v5607_v10 = vld [vmem:[#allocation5 + $0x718] ss:$20 sps:$4 sm:$0xff]  }
 0x102   :  { %2302 = vmatprep.subr.bf16.mxu1 %v5554_v11  ;;  %v5620_v11 = vld [vmem:[#allocation7 + $0x4] ss:$20 sps:$4 sm:$0xff]  }
 0x104   :  { %2141 = vmatpush1.bf16.msra.mxu0 %v5549_v12  ;;  %v5609_v12 = vld [vmem:[#allocation5 + $0x5d8] ss:$20 sps:$4 sm:$0xff]  }
 0x105   :  { %2303 = vmatpush1.bf16.msra.mxu1 %v5552_v14  ;;  %2142 = vmatprep.subr.bf16.mxu0 %v5557_v15  ;;  %v5611_v14 = vld [vmem:[#allocation5 + $0x740] ss:$20 sps:$4 sm:$0xff]  }
 0x106   :  { %2304 = vmatprep.subr.bf16.mxu1 %v5560_v16  ;;  %v5613_v15 = vld [vmem:[#allocation5 + $0x600] ss:$20 sps:$4 sm:$0xff]   ;;  %v5618_v16 = vld [vmem:[#allocation7] ss:$20 sps:$4 sm:$0xff]  }
 0x108   :  { %2143 = vmatpush1.bf16.msra.mxu0 %v5555_v17  ;;  %v5615_v17 = vld [vmem:[#allocation5 + $0x768] ss:$20 sps:$4 sm:$0xff]  }
 0x109   :  { %2305 = vmatpush1.bf16.msra.mxu1 %v5558_v19  ;;  %4990 = vmatprep.subr.bf16.mxu0 %v5566_v22  ;;  %v5626_v19 = vld [vmem:[#allocation7 + $0x2c] ss:$20 sps:$4 sm:$0xff]   ;;  %v5624_v22 = vld [vmem:[#allocation7 + $0x28] ss:$20 sps:$4 sm:$0xff]  }
 0x10a   :  { %2306 = vmatprep.subr.bf16.mxu1 %v5565_v21  ;;  %v5616_v21 = vld [vmem:[#allocation5 + $0x628] ss:$20 sps:$4 sm:$0xff]  }
 0x10b   :  { %2145 = vmatmul.mubr.bf16.vlgmr.msra.gmra.mrb[0].mxu0 %v6237_v23 }
 0x10c   :  { %4991 = vmatpush3.bf16.msra.mxu0 %v5567_v25  ;;  %2390 = vmatprep.mubr.bf16.mxu0 %v6205_v52  ;;  %v5580_v52 = vld [vmem:[#allocation5 + $0xd8] ss:$20 sps:$4 sm:$0xff]   ;;  %v5621_v25 = vld [vmem:[#allocation7 + $0x8] ss:$20 sps:$4 sm:$0xff]  }
 0x10d   :  { %2307 = vmatpush1.bf16.msra.mxu1 %v5563_v24  ;;  %4992 = vmatprep.subr.bf16.mxu0 %v5568_v26  ;;  %v5632_v24 = vld [vmem:[#allocation7 + $0x54] ss:$20 sps:$4 sm:$0xff]   ;;  %v5630_v26 = vld [vmem:[#allocation7 + $0x50] ss:$20 sps:$4 sm:$0xff]  }
 0x10e   :  { %2317 = vmatprep.subr.bf16.mxu1 %v5574_v27  ;;  %v5629_v27 = vld [vmem:[#allocation7 + $0x34] ss:$20 sps:$4 sm:$0xff]  }
 0x110   :  { %2309 = vmatmul.mubr.bf16.vlgmr.msra.gmra.mrb[4].mxu1 %v6237_v23  ;;  %4993 = vmatpush3.bf16.msra.mxu0 %v5569_v28  ;;  %v5638_v28 = vld [vmem:[#allocation7 + $0x7c] ss:$20 sps:$4 sm:$0xff]  }
 0x111   :  { %2318 = vmatpush1.bf16.msra.mxu1 %v5572_v29  ;;  %4994 = vmatprep.subr.bf16.mxu0 %v5570_v30  ;;  %v5627_v29 = vld [vmem:[#allocation7 + $0x30] ss:$20 sps:$4 sm:$0xff]   ;;  %v5636_v30 = vld [vmem:[#allocation7 + $0x78] ss:$20 sps:$4 sm:$0xff]  }
 0x112   :  { %2349 = vmatprep.mubr.bf16.mxu1 %v6105_v0  ;;  %5012 = vmatprep.subr.bf16.mxu1 %v5585_v31  ;;  %v5635_v31 = vld [vmem:[#allocation7 + $0x5c] ss:$20 sps:$4 sm:$0xff]  }
 0x114   :  { %4995 = vmatpush3.bf16.msra.mxu0 %v5571_v18  ;;  %v5644_v18 = vld [vmem:[#allocation7 + $0xa4] ss:$20 sps:$4 sm:$0xff]  }
 0x115   :  { %4996 = vmatprep.subr.bf16.mxu0 %v5575_v32  ;;  %v5633_v32 = vld [vmem:[#allocation7 + $0x58] ss:$20 sps:$4 sm:$0xff]  }
 0x118   :  { %4997 = vmatpush3.bf16.msra.mxu0 %v5576_v33  ;;  %v5642_v33 = vld [vmem:[#allocation7 + $0xa0] ss:$20 sps:$4 sm:$0xff]  }
 0x119   :  { %4998 = vmatprep.subr.bf16.mxu0 %v5577_v34  ;;  %v5641_v34 = vld [vmem:[#allocation7 + $0x84] ss:$20 sps:$4 sm:$0xff]  }
 0x11c   :  { %4747 = vmatmul.mubr.msk.bf16.vlgmr.msra.gmra.mrb[4].mxu1 %vm2026_vm0, %v6243_v41  ;;  %4999 = vmatpush3.bf16.msra.mxu0 %v5578_v36  ;;  %v5650_v36 = vld [vmem:[#allocation7 + $0xcc] ss:$20 sps:$4 sm:$0xff]  }
 0x11d   :  { %5013 = vmatpush3.bf16.msra.mxu1 %v5586_v37  ;;  %5000 = vmatprep.subr.bf16.mxu0 %v5579_v38  ;;  %v5639_v37 = vld [vmem:[#allocation7 + $0x80] ss:$20 sps:$4 sm:$0xff]   ;;  %v5648_v38 = vld [vmem:[#allocation7 + $0xc8] ss:$20 sps:$4 sm:$0xff]  }
 0x11e   :  { %5014 = vmatprep.subr.bf16.mxu1 %v5588_v39  ;;  %2430 = vmatprep.mubr.bf16.mxu1 %v6217_v35  ;;  %v5647_v39 = vld [vmem:[#allocation7 + $0xac] ss:$20 sps:$4 sm:$0xff]  }
 0x120   :  { %5001 = vmatpush3.bf16.msra.mxu0 %v5580_v52  ;;  %v5653_v52 = vld [vmem:[#allocation7 + $0xd4] ss:$20 sps:$4 sm:$0xff]  }
 0x121   :  { %5015 = vmatpush3.bf16.msra.mxu1 %v5590_v40  ;;  %5002 = vmatprep.subr.bf16.mxu0 %v5581_v42  ;;  %v5651_v40 = vld [vmem:[#allocation7 + $0xd0] ss:$20 sps:$4 sm:$0xff]  }
 0x122   :  { %5016 = vmatprep.subr.bf16.mxu1 %v5592_v43  ;;  %v5659_v42 = vld [vmem:[#allocation7 + $0xfc] ss:$20 sps:$4 sm:$0xff]  }
 0x123   :  { %v6248_v50 = vpop.f32.mrb[0].mxu1  ;;  %v5654_v43 = vld [vmem:[#allocation7 + $0xf0] ss:$20 sps:$4 sm:$0xff]  }
 0x124   :  { %v6250_v54 = vpop.f32.mrb[1].mxu1  ;;  %5003 = vmatpush3.bf16.msra.mxu0 %v5582_v44  ;;  %v5657_v44 = vld [vmem:[#allocation7 + $0xf8] ss:$20 sps:$4 sm:$0xff]  }
 0x125   :  { %5017 = vmatpush3.bf16.msra.mxu1 %v5594_v45  ;;  %v2191_v55 = vpop.f32.mrb[2].mxu1  ;;  %5004 = vmatprep.subr.bf16.mxu0 %v5583_v46  ;;  %v5662_v45 = vld [vmem:[#allocation7 + $0x11c] ss:$20 sps:$4 sm:$0xff]   ;;  %v5665_v46 = vld [vmem:[#allocation7 + $0x124] ss:$20 sps:$4 sm:$0xff]  }
 0x126   :  { %5018 = vmatprep.subr.bf16.mxu1 %v5596_v47  ;;  %v2192_v35 = vpop.f32.mrb[3].mxu1  ;;  %v5660_v47 = vld [vmem:[#allocation7 + $0x118] ss:$20 sps:$4 sm:$0xff]   ;;  %v5669_v55 = vld [vmem:[#allocation7 + $0x148] ss:$20 sps:$4 sm:$0xff]  }
 0x127   :  { %v5674_v35 = vld [vmem:[#allocation7 + $0x16c] ss:$20 sps:$4 sm:$0xff]  }
 0x128   :  { %5005 = vmatpush3.bf16.msra.mxu0 %v5584_v48  ;;  %v5663_v48 = vld [vmem:[#allocation7 + $0x120] ss:$20 sps:$4 sm:$0xff]  }
 0x129   :  { %5019 = vmatpush3.bf16.msra.mxu1 %v5598_v49  ;;  %5034 = vmatprep.subr.bf16.mxu0 %v5587_v51  ;;  %v5668_v49 = vld [vmem:[#allocation7 + $0x144] ss:$20 sps:$4 sm:$0xff]   ;;  %v5671_v51 = vld [vmem:[#allocation7 + $0x14c] ss:$20 sps:$4 sm:$0xff]  }
 0x12a   :  { %5020 = vmatprep.subr.bf16.mxu1 %v5600_v53  ;;  %v5666_v53 = vld [vmem:[#allocation7 + $0x140] ss:$20 sps:$4 sm:$0xff]  }
 0x12b   :  { %2391 = vmatmul.mubr.bf16.vlgmr.msra.gmra.mrb[4].mxu0 %v6209_v8  ;;  %v5605_v8 = vld [vmem:[#allocation5 + $0x5b0] ss:$20 sps:$4 sm:$0xff]  }
 0x12c   :  { %5035 = vmatpush3.bf16.msra.mxu0 %v5589_v56  ;;  %2470 = vmatprep.mubr.bf16.mxu0 %v6229_v20  ;;  %v6106_v20 = vmov 0.0   ;;  %v5677_v56 = vld [vmem:[#allocation7 + $0x174] ss:$20 sps:$4 sm:$0xff]  }
 0x12d   :  { %5021 = vmatpush3.bf16.msra.mxu1 %v5602_v57  ;;  %5036 = vmatprep.subr.bf16.mxu0 %v5591_v58  ;;  %v5672_v57 = vld [vmem:[#allocation7 + $0x168] ss:$20 sps:$4 sm:$0xff]   ;;  %v5675_v58 = vld [vmem:[#allocation7 + $0x170] ss:$20 sps:$4 sm:$0xff]  }
 0x12e   :  { %5022 = vmatprep.subr.bf16.mxu1 %v5604_v59  ;;  %v5680_v59 = vld [vmem:[#allocation7 + $0x194] ss:$20 sps:$4 sm:$0xff]  }
 0x130   :  { %5037 = vmatpush3.bf16.msra.mxu0 %v5593_v60  ;;  %v5683_v60 = vld [vmem:[#allocation7 + $0x19c] ss:$20 sps:$4 sm:$0xff]  }
 0x131   :  { %5023 = vmatpush3.bf16.msra.mxu1 %v5606_v61  ;;  %5038 = vmatprep.subr.bf16.mxu0 %v5595_v62  ;;  %v5678_v61 = vld [vmem:[#allocation7 + $0x190] ss:$20 sps:$4 sm:$0xff]   ;;  %v5681_v62 = vld [vmem:[#allocation7 + $0x198] ss:$20 sps:$4 sm:$0xff]  }
 0x132   :  { %5024 = vmatprep.subr.bf16.mxu1 %v5608_v63  ;;  %v5686_v63 = vld [vmem:[#allocation7 + $0x1bc] ss:$20 sps:$4 sm:$0xff]  }
 0x134   :  { %5039 = vmatpush3.bf16.msra.mxu0 %v5597_v1  ;;  %v5689_v1 = vld [vmem:[#allocation7 + $0x1c4] ss:$20 sps:$4 sm:$0xff]  }
 0x135   :  { %5025 = vmatpush3.bf16.msra.mxu1 %v5610_v2  ;;  %5040 = vmatprep.subr.bf16.mxu0 %v5599_v3  ;;  %v5684_v2 = vld [vmem:[#allocation7 + $0x1b8] ss:$20 sps:$4 sm:$0xff]   ;;  %v5687_v3 = vld [vmem:[#allocation7 + $0x1c0] ss:$20 sps:$4 sm:$0xff]  }
 0x136   :  { %5026 = vmatprep.subr.bf16.mxu1 %v5612_v4  ;;  %v5692_v4 = vld [vmem:[#allocation7 + $0x1e4] ss:$20 sps:$4 sm:$0xff]  }
 0x138   :  { %5041 = vmatpush3.bf16.msra.mxu0 %v5601_v5  ;;  %v5695_v5 = vld [vmem:[#allocation7 + $0x1ec] ss:$20 sps:$4 sm:$0xff]  }
 0x139   :  { %5027 = vmatpush3.bf16.msra.mxu1 %v5614_v6  ;;  %5042 = vmatprep.subr.bf16.mxu0 %v5603_v7  ;;  %v5690_v6 = vld [vmem:[#allocation7 + $0x1e0] ss:$20 sps:$4 sm:$0xff]   ;;  %v5693_v7 = vld [vmem:[#allocation7 + $0x1e8] ss:$20 sps:$4 sm:$0xff]  }
 0x13a   :  { %5164 = vmatprep.subr.bf16.mxu1 %v6106_v20 }
 0x13c   :  { %2431 = vmatmul.mubr.bf16.vlgmr.msra.gmra.mrb[8].mxu1 %v6223_v13  ;;  %5043 = vmatpush3.bf16.msra.mxu0 %v5605_v8  ;;  %v5623_v13 = vld [vmem:[#allocation7 + $0xc] ss:$20 sps:$4 sm:$0xff]  }
 0x13d   :  { %5165 = vmatpush3.bf16.msra.mxu1 %v5617_v9  ;;  %5044 = vmatprep.subr.bf16.mxu0 %v5607_v10  ;;  %v5698_v8 = vld [vmem:[#allocation7 + $0x20c] ss:$20 sps:$4 sm:$0xff]   ;;  %v5701_v9 = vld [vmem:[#allocation7 + $0x214] ss:$20 sps:$4 sm:$0xff]  }
 0x13e   :  { %5166 = vmatprep.mubr.msk.bf16.mxu1 %vm6107_vm1, %v6106_v20  ;;  %3664 = vmatprep.subr.bf16.mxu1 %v5620_v11  ;;  %v5696_v10 = vld [vmem:[#allocation7 + $0x208] ss:$20 sps:$4 sm:$0xff]   ;;  %v5699_v11 = vld [vmem:[#allocation7 + $0x210] ss:$20 sps:$4 sm:$0xff]  }
 0x140   :  { %5045 = vmatpush3.bf16.msra.mxu0 %v5609_v12  ;;  %v5704_v12 = vld [vmem:[#allocation7 + $0x234] ss:$20 sps:$4 sm:$0xff]  }
 0x141   :  { %5046 = vmatprep.subr.bf16.mxu0 %v5611_v14  ;;  %v5707_v14 = vld [vmem:[#allocation7 + $0x23c] ss:$20 sps:$4 sm:$0xff]  }
 0x144   :  { %5167 = vmatmul.mubr.msk.bf16.vlgmr.msra.gmra.mrb[12].mxu1 %vm2026_vm0, %v6243_v41  ;;  %5047 = vmatpush3.bf16.msra.mxu0 %v5613_v15  ;;  %v5656_v41 = vld [vmem:[#allocation7 + $0xf4] ss:$20 sps:$4 sm:$0xff]   ;;  %v5702_v15 = vld [vmem:[#allocation7 + $0x230] ss:$20 sps:$4 sm:$0xff]  }
 0x145   :  { %3665 = vmatpush1.bf16.msra.mxu1 %v5618_v16  ;;  %5048 = vmatprep.subr.bf16.mxu0 %v5615_v17  ;;  %v5705_v16 = vld [vmem:[#allocation7 + $0x238] ss:$20 sps:$4 sm:$0xff]   ;;  %v5710_v17 = vld [vmem:[#allocation7 + $0x25c] ss:$20 sps:$4 sm:$0xff]  }
 0x146   :  { %3666 = vmatprep.subr.bf16.mxu1 %v5626_v19  ;;  %v5713_v19 = vld [vmem:[#allocation7 + $0x264] ss:$20 sps:$4 sm:$0xff]  }
 0x148   :  { %5049 = vmatpush3.bf16.msra.mxu0 %v5616_v21  ;;  %v5708_v21 = vld [vmem:[#allocation7 + $0x258] ss:$20 sps:$4 sm:$0xff]  }
 0x149   :  { %3667 = vmatpush1.bf16.msra.mxu1 %v5624_v22  ;;  %3787 = vmatprep.subr.bf16.mxu0 %v5623_v13  ;;  %v5711_v22 = vld [vmem:[#allocation7 + $0x260] ss:$20 sps:$4 sm:$0xff]   ;;  %v5716_v13 = vld [vmem:[#allocation7 + $0x284] ss:$20 sps:$4 sm:$0xff]  }
 0x14a   :  { %3668 = vmatprep.subr.bf16.mxu1 %v5632_v24  ;;  %v5719_v24 = vld [vmem:[#allocation7 + $0x28c] ss:$20 sps:$4 sm:$0xff]  }
 0x14b   :  { %2471 = vmatmul.mubr.bf16.vlgmr.msra.gmra.mrb[8].mxu0 %v6237_v23  ;;  %v5645_v23 = vld [vmem:[#allocation7 + $0xa8] ss:$20 sps:$4 sm:$0xff]  }
 0x14c   :  { %3788 = vmatpush1.bf16.msra.mxu0 %v5621_v25  ;;  %v703_v25 = vlaneseq }
 0x14d   :  { %3669 = vmatpush1.bf16.msra.mxu1 %v5630_v26  ;;  %3789 = vmatprep.subr.bf16.mxu0 %v5629_v27 }
 0x14e   :  { %3670 = vmatprep.subr.bf16.mxu1 %v5638_v28  ;;  %v6261_v26 = vshrl.u32 %v703_v25, 7  ;;  %v6267_v28 = vld [vmem:[%s6410_s2] sm:$0x1f] }
 0x150   :  { %3790 = vmatpush1.bf16.msra.mxu0 %v5627_v29  ;;  %v705_v27 = vsub.s32 0, %v6261_v26  ;;  %v709_v29 = vsub.s32 1, %v6261_v26  ;;  %v713_v25 = vsub.s32 2, %v6261_v26 }
 0x151   :  { %3671 = vmatpush1.bf16.msra.mxu1 %v5636_v30  ;;  %3791 = vmatprep.subr.bf16.mxu0 %v5635_v31 }
 0x152   :  { %3672 = vmatprep.subr.bf16.mxu1 %v5644_v18  ;;  %v706_v30 = vrot.slane %v6267_v28, %v705_v27  ;;  %v710_v31 = vrot.slane %v6267_v28, %v709_v29 }
 0x154   :  { %3792 = vmatpush1.bf16.msra.mxu0 %v5633_v32 }
 0x155   :  { %3673 = vmatpush1.bf16.msra.mxu1 %v5642_v33  ;;  %3793 = vmatprep.subr.bf16.mxu0 %v5641_v34 }
 0x156   :  { %3674 = vmatprep.subr.bf16.mxu1 %v5650_v36 }
 0x158   :  { %3794 = vmatpush1.bf16.msra.mxu0 %v5639_v37 }
 0x159   :  { %3675 = vmatpush1.bf16.msra.mxu1 %v5648_v38  ;;  %3795 = vmatprep.subr.bf16.mxu0 %v5647_v39 }
 0x15a   :  { %3676 = vmatprep.subr.bf16.mxu1 %v5656_v41 }
 0x15c   :  { %3796 = vmatpush1.bf16.msra.mxu0 %v5645_v23 }
 0x15d   :  { %3797 = vmatprep.subr.bf16.mxu0 %v5653_v52  ;;  %3677 = vmatpush1.bf16.msra.mxu1 %v5654_v43 }
 0x15e   :  { %3678 = vmatprep.subr.bf16.mxu1 %v5662_v45 }
 0x160   :  { %3798 = vmatpush1.bf16.msra.mxu0 %v5651_v40 }
 0x161   :  { %3799 = vmatprep.subr.bf16.mxu0 %v5659_v42  ;;  %3679 = vmatpush1.bf16.msra.mxu1 %v5660_v47 }
 0x162   :  { %3680 = vmatprep.subr.bf16.mxu1 %v5668_v49 }
 0x164   :  { %3800 = vmatpush1.bf16.msra.mxu0 %v5657_v44  ;;  %v717_v44 = vsub.s32 3, %v6261_v26 }
 0x165   :  { %3801 = vmatprep.subr.bf16.mxu0 %v5665_v46  ;;  %3681 = vmatpush1.bf16.msra.mxu1 %v5666_v53 }
 0x166   :  { %3682 = vmatprep.subr.bf16.mxu1 %v5674_v35  ;;  %v718_v45 = vrot.slane %v6267_v28, %v717_v44 }
 0x168   :  { %3802 = vmatpush1.bf16.msra.mxu0 %v5663_v48 }
 0x169   :  { %3803 = vmatprep.subr.bf16.mxu0 %v5671_v51  ;;  %3683 = vmatpush1.bf16.msra.mxu1 %v5672_v57 }
 0x16a   :  { %3684 = vmatprep.subr.bf16.mxu1 %v5680_v59 }
 0x16c   :  { %3804 = vmatpush1.bf16.msra.mxu0 %v5669_v55 }
 0x16d   :  { %3805 = vmatprep.subr.bf16.mxu0 %v5677_v56  ;;  %3685 = vmatpush1.bf16.msra.mxu1 %v5678_v61 }
 0x16e   :  { %3686 = vmatprep.subr.bf16.mxu1 %v5686_v63 }
 0x170   :  { %3806 = vmatpush1.bf16.msra.mxu0 %v5675_v58 }
 0x171   :  { %3807 = vmatprep.subr.bf16.mxu0 %v5683_v60  ;;  %3687 = vmatpush1.bf16.msra.mxu1 %v5684_v2 }
 0x172   :  { %3688 = vmatprep.subr.bf16.mxu1 %v5692_v4 }
 0x174   :  { %3808 = vmatpush1.bf16.msra.mxu0 %v5681_v62 }
 0x175   :  { %3809 = vmatprep.subr.bf16.mxu0 %v5689_v1  ;;  %3689 = vmatpush1.bf16.msra.mxu1 %v5690_v6 }
 0x176   :  { %3690 = vmatprep.subr.bf16.mxu1 %v5698_v8 }
 0x178   :  { %3810 = vmatpush1.bf16.msra.mxu0 %v5687_v3 }
 0x179   :  { %3811 = vmatprep.subr.bf16.mxu0 %v5695_v5  ;;  %3691 = vmatpush1.bf16.msra.mxu1 %v5696_v10 }
 0x17a   :  { %3692 = vmatprep.subr.bf16.mxu1 %v5704_v12 }
 0x17c   :  { %3812 = vmatpush1.bf16.msra.mxu0 %v5693_v7 }
 0x17d   :  { %3813 = vmatprep.subr.bf16.mxu0 %v5701_v9  ;;  %3693 = vmatpush1.bf16.msra.mxu1 %v5702_v15 }
 0x17e   :  { %3694 = vmatprep.subr.bf16.mxu1 %v5710_v17 }
 0x180   :  { %3814 = vmatpush1.bf16.msra.mxu0 %v5699_v11 }
 0x181   :  { %3815 = vmatprep.subr.bf16.mxu0 %v5707_v14  ;;  %3695 = vmatpush1.bf16.msra.mxu1 %v5708_v21 }
 0x182   :  { %3705 = vmatprep.subr.bf16.mxu1 %v5716_v13 }
 0x184   :  { %3816 = vmatpush1.bf16.msra.mxu0 %v5705_v16 }
 0x185   :  { %3817 = vmatprep.subr.bf16.mxu0 %v5713_v19  ;;  %v721_v19 = vsub.s32 4, %v6261_v26 }
 0x188   :  { %3818 = vmatpush1.bf16.msra.mxu0 %v5711_v22 }
 0x189   :  { %3828 = vmatprep.subr.bf16.mxu0 %v5719_v24 }
 0x1de   :  { %v2146_v18 = vpop.f32.mrb[0].mxu0 }
 0x1df   :  { %v5210_v32 = vadd.f32 %v2146_v18, %v706_v30  ;;  %v2148_v33 = vpop.f32.mrb[1].mxu0  ;;  %v5717_v18 = vld [vmem:[#allocation7 + $0x288] ss:$20 sps:$4 sm:$0xff]  }
 0x1e0   :  { %v5212_v34 = vadd.f32 %v2148_v33, %v710_v31  ;;  %v2150_v36 = vpop.f32.mrb[2].mxu0  ;;  %v5714_v31 = vld [vmem:[#allocation7 + $0x280] ss:$20 sps:$4 sm:$0xff]  }
 0x1e1   :  { %v5211_v37 = vadd.f32 %v5210_v32, %v6248_v50  ;;  %v2151_v38 = vpop.f32.mrb[3].mxu0  ;;  %v722_v32 = vrot.slane %v6267_v28, %v721_v19  ;;  %v5725_v36 = vld [vmem:[#allocation7 + $0x2b4] ss:$20 sps:$4 sm:$0xff]  }
 0x1e2   :  { %v5213_v39 = vadd.f32 %v5212_v34, %v6250_v54  ;;  %v5722_v34 = vld [vmem:[#allocation7 + $0x2ac] ss:$20 sps:$4 sm:$0xff]  }
 0x1e3   :  { %v2523_v23 = vand.u32 2147483647, %v5211_v37  ;;  %v2518_v14 = vmax.f32 %v5211_v37, 0.0 }
 0x1e4   :  { %v2524_v52 = vand.u32 2147483647, %v5213_v39  ;;  %v2519_v17 = vmax.f32 %v5213_v39, 0.0  ;;  %v714_v39 = vrot.slane %v6267_v28, %v713_v25 }
 0x1e5   :  { %v2528_v40 = vsub.f32 0.0, %v2523_v23  ;;  %v5720_v23 = vld [vmem:[#allocation7 + $0x2a8] ss:$20 sps:$4 sm:$0xff]  }
 0x1e6   :  { %v2529_v41 = vsub.f32 0.0, %v2524_v52  ;;  %v5723_v52 = vld [vmem:[#allocation7 + $0x2b0] ss:$20 sps:$4 sm:$0xff]  }
 0x1e7   :  { %v2533_v42 = vmul.f32 1.442695, %v2528_v40 }
 0x1e8   :  { %v2535_v43 = vmul.f32 1.442695, %v2529_v41 }
 0x1e9   :  { %5938 = vpow2.f32 %v2533_v42 }
 0x1ea   :  { %5940 = vpow2.f32 %v2535_v43  ;;  %v5728_v43 = vld [vmem:[#allocation7 + $0x2d4] ss:$20 sps:$4 sm:$0xff]  }
 0x1ef   :  { %v6282_v46 = vpop.f32.mrb[4].mxu1 }
 0x1f0   :  { %v2353_v50 = vpop.f32.mrb[5].mxu1 }
 0x1f1   :  { %v6284_v47 = vadd.f32 %v2353_v50, %v718_v45  ;;  %v2355_v54 = vpop.f32.mrb[6].mxu1  ;;  %v5731_v45 = vld [vmem:[#allocation7 + $0x2dc] ss:$20 sps:$4 sm:$0xff]  }
 0x1f2   :  { %v2356_v48 = vpop.f32.mrb[7].mxu1 }
 0x1f3   :  { %v2526_v49 = vand.u32 2147483647, %v6284_v47  ;;  %v5939_v51 = vpop.eup %5938 }
 0x1f4   :  { %v5941_v53 = vpop.eup %5940  ;;  %v2543_v55 = vadd.f32 1.0, %v5939_v51  ;;  %v2546_v58 = vmul.f32 -0.5, %v5939_v51  ;;  %v2549_v62 = vand.u32 2147483647, %v5939_v51 }
 0x1f5   :  { %v2531_v35 = vsub.f32 0.0, %v2526_v49  ;;  %v2552_v56 = vadd.f32 1.0, %v5941_v53  ;;  %v2555_v59 = vmul.f32 -0.5, %v5941_v53  ;;  %v2558_v9 = vand.u32 2147483647, %v5941_v53 }
 0x1f6   :  { %5942 = vlog2.f32 %v2543_v55  ;;  %v2547_v60 = vadd.f32 1.0, %v2546_v58  ;;  %vm2550_vm2 = vcmp.lt.f32.partialorder %v2549_v62, 0.0004427343  ;;  %v6305_v55 = vadd.f32 %v6282_v46, %v714_v39  ;;  %v5732_v62 = vld [vmem:[#allocation7 + $0x2f8] ss:$20 sps:$4 sm:$0xff]  }
 0x1f7   :  { %v2539_v57 = vmul.f32 1.442695, %v2531_v35  ;;  %v2556_v5 = vadd.f32 1.0, %v2555_v59  ;;  %vm2559_vm3 = vcmp.lt.f32.partialorder %v2558_v9, 0.0004427343 }
 0x1f8   :  { %v2548_v8 = vmul.f32 %v5939_v51, %v2547_v60  ;;  %v5726_v35 = vld [vmem:[#allocation7 + $0x2d0] ss:$20 sps:$4 sm:$0xff]   ;;  %v5735_v46 = vld [vmem:[#allocation7 + $0x300] ss:$20 sps:$4 sm:$0xff]   ;;  %v5741_v9 = vld [vmem:[#allocation7 + $0x328] ss:$20 sps:$4 sm:$0xff]  }
 0x1f9   :  { %5944 = vpow2.f32 %v2539_v57  ;;  %v2557_v16 = vmul.f32 %v5941_v53, %v2556_v5  ;;  %v2521_v53 = vmax.f32 %v6284_v47, 0.0  ;;  %v5734_v59 = vld [vmem:[#allocation7 + $0x2fc] ss:$20 sps:$4 sm:$0xff]   ;;  %v5737_v60 = vld [vmem:[#allocation7 + $0x304] ss:$20 sps:$4 sm:$0xff]  }
 0x1fa   :  { %5946 = vlog2.f32 %v2552_v56  ;;  %v5729_v56 = vld [vmem:[#allocation7 + $0x2d8] ss:$20 sps:$4 sm:$0xff]   ;;  %v2525_v47 = vand.u32 2147483647, %v6305_v55 }
 0x1fb   :  { %v5756_v39 = vld [vmem:[#allocation7 + $0x398] ss:$20 sps:$4 sm:$0xff]  }
 0x1fe   :  { %v5006_v61 = vpop.f32.mrb[4].mxu0 }
 0x1ff   :  { %v5007_v63 = vpop.f32.mrb[5].mxu0 }
 0x200   :  { %v5943_v1 = vpop.eup %5942  ;;  %v5008_v2 = vadd.f32 %v5007_v63, %v5006_v61  ;;  %v5009_v3 = vpop.f32.mrb[6].mxu0 }
 0x201   :  { %v2545_v4 = vmul.f32 0.6931472, %v5943_v1  ;;  %v5010_v6 = vpop.f32.mrb[7].mxu0  ;;  %v5743_v3 = vld [vmem:[#allocation7 + $0x32c] ss:$20 sps:$4 sm:$0xff]  }
 0x202   :  { %v2393_v40 = vadd.f32 %v5008_v2, %v722_v32  ;;  %v5740_v2 = vld [vmem:[#allocation7 + $0x324] ss:$20 sps:$4 sm:$0xff]  }
 0x203   :  { %v5945_v7 = vpop.eup %5944  ;;  %v2551_v12 = vsel %vm2550_vm2, %v2548_v8, %v2545_v4  ;;  %v5738_v8 = vld [vmem:[#allocation7 + $0x320] ss:$20 sps:$4 sm:$0xff]   ;;  %v5753_v32 = vld [vmem:[#allocation7 + $0x378] ss:$20 sps:$4 sm:$0xff]  }
 0x204   :  { %v5947_v10 = vpop.eup %5946  ;;  %v2570_v11 = vadd.f32 1.0, %v5945_v7  ;;  %v2588_v21 = vadd.f32 %v2551_v12, %v2518_v14  ;;  %v2573_v24 = vmul.f32 -0.5, %v5945_v7  ;;  %v2576_v38 = vand.u32 2147483647, %v5945_v7  ;;  %v5744_v12 = vld [vmem:[#allocation7 + $0x348] ss:$20 sps:$4 sm:$0xff]  }
 0x205   :  { %v2554_v15 = vmul.f32 0.6931472, %v5947_v10  ;;  %v5746_v10 = vld [vmem:[#allocation7 + $0x34c] ss:$20 sps:$4 sm:$0xff]  }
 0x206   :  { %5948 = vlog2.f32 %v2570_v11  ;;  %v6294_v33 = vpack.c.bf16 %v2588_v21, %v2588_v21  ;;  %v2574_v37 = vadd.f32 1.0, %v2573_v24  ;;  %vm2577_vm4 = vcmp.lt.f32.partialorder %v2576_v38, 0.0004427343  ;;  %v5749_v11 = vld [vmem:[#allocation7 + $0x354] ss:$20 sps:$4 sm:$0xff]  }
 0x207   :  { %v2560_v22 = vsel %vm2559_vm3, %v2557_v16, %v2554_v15  ;;  %v5747_v15 = vld [vmem:[#allocation7 + $0x350] ss:$20 sps:$4 sm:$0xff]   ;;  %v5752_v21 = vld [vmem:[#allocation7 + $0x374] ss:$20 sps:$4 sm:$0xff]  }
 0x208   :  { %v2589_v13 = vadd.f32 %v2560_v22, %v2519_v17  ;;  %v2575_v48 = vmul.f32 %v5945_v7, %v2574_v37  ;;  %v2530_v7 = vsub.f32 0.0, %v2525_v47  ;;  %v5755_v22 = vld [vmem:[#allocation7 + $0x37c] ss:$20 sps:$4 sm:$0xff]   ;;  %v5761_v37 = vld [vmem:[#allocation7 + $0x3a4] ss:$20 sps:$4 sm:$0xff]  }
 0x20a   :  { %v6289_v30 = vpack.c.bf16 %v2589_v13, %v2589_v13  ;;  %v2537_v14 = vmul.f32 1.442695, %v2530_v7 }
 0x20c   :  { %3696 = vmatprep.mubr.bf16.mxu1 %v6289_v30  ;;  %3819 = vmatprep.mubr.bf16.mxu0 %v6289_v30  ;;  %5950 = vpow2.f32 %v2537_v14 }
 0x20d   :  { %3697 = vmatmul.mubr.bf16.vlgmr.msra.gmra.mrb[16].mxu1 %v6294_v33  ;;  %3820 = vmatmul.mubr.bf16.vlgmr.msra.gmra.mrb[12].mxu0 %v6294_v33 }
 0x20e   :  { %3706 = vmatpush1.bf16.msra.mxu1 %v5714_v31  ;;  %3829 = vmatpush1.bf16.msra.mxu0 %v5717_v18  ;;  %v5750_v18 = vld [vmem:[#allocation7 + $0x370] ss:$20 sps:$4 sm:$0xff]  }
 0x20f   :  { %v5028_v41 = vpop.f32.mrb[8].mxu1  ;;  %3707 = vmatprep.subr.bf16.mxu1 %v5722_v34  ;;  %3830 = vmatprep.subr.bf16.mxu0 %v5725_v36  ;;  %v5758_v36 = vld [vmem:[#allocation7 + $0x39c] ss:$20 sps:$4 sm:$0xff]  }
 0x210   :  { %v5949_v42 = vpop.eup %5948  ;;  %v5029_v50 = vpop.f32.mrb[9].mxu1 }
 0x211   :  { %v2572_v54 = vmul.f32 0.6931472, %v5949_v42  ;;  %v5030_v49 = vadd.f32 %v5029_v50, %v5028_v41  ;;  %v5031_v51 = vpop.f32.mrb[10].mxu1  ;;  %v5762_v41 = vld [vmem:[#allocation7 + $0x3c0] ss:$20 sps:$4 sm:$0xff]  }
 0x212   :  { %v5032_v28 = vpop.f32.mrb[11].mxu1  ;;  %3708 = vmatpush1.bf16.msra.mxu1 %v5720_v23  ;;  %3831 = vmatpush1.bf16.msra.mxu0 %v5723_v52  ;;  %v5759_v23 = vld [vmem:[#allocation7 + $0x3a0] ss:$20 sps:$4 sm:$0xff]   ;;  %v5764_v52 = vld [vmem:[#allocation7 + $0x3c4] ss:$20 sps:$4 sm:$0xff]  }
 0x213   :  { %v2578_v57 = vsel %vm2577_vm4, %v2575_v48, %v2572_v54  ;;  %v2433_v58 = vadd.f32 %v5030_v49, %v2393_v40  ;;  %3709 = vmatprep.subr.bf16.mxu1 %v5728_v43  ;;  %3832 = vmatprep.subr.bf16.mxu0 %v5731_v45  ;;  %v5767_v40 = vld [vmem:[#allocation7 + $0x3cc] ss:$20 sps:$4 sm:$0xff]   ;;  %v5765_v42 = vld [vmem:[#allocation7 + $0x3c8] ss:$20 sps:$4 sm:$0xff]   ;;  %v5771_v48 = vld [vmem:[#allocation7 + $0x3f0] ss:$20 sps:$4 sm:$0xff]  }
 0x214   :  { %v2591_v61 = vadd.f32 %v2578_v57, %v2521_v53  ;;  %v5770_v43 = vld [vmem:[#allocation7 + $0x3ec] ss:$20 sps:$4 sm:$0xff]   ;;  %v5773_v45 = vld [vmem:[#allocation7 + $0x3f4] ss:$20 sps:$4 sm:$0xff]   ;;  %v5779_v53 = vld [vmem:[#allocation7 + $0x41c] ss:$20 sps:$4 sm:$0xff]  }
 0x215   :  { %v5768_v54 = vld [vmem:[#allocation7 + $0x3e8] ss:$20 sps:$4 sm:$0xff]   ;;  %v5774_v28 = vld [vmem:[#allocation7 + $0x410] ss:$20 sps:$4 sm:$0xff]  }
 0x216   :  { %v6307_v63 = vpack.c.bf16 %v2591_v61, %v2591_v61  ;;  %3710 = vmatpush1.bf16.msra.mxu1 %v5726_v35  ;;  %3833 = vmatpush1.bf16.msra.mxu0 %v5729_v56  ;;  %v5951_v50 = vpop.eup %5950  ;;  %v5776_v51 = vld [vmem:[#allocation7 + $0x414] ss:$20 sps:$4 sm:$0xff]   ;;  %v5777_v35 = vld [vmem:[#allocation7 + $0x418] ss:$20 sps:$4 sm:$0xff]   ;;  %v5782_v56 = vld [vmem:[#allocation7 + $0x43c] ss:$20 sps:$4 sm:$0xff]  }
 0x217   :  { %v2512_v1 = vpop.f32.mrb[12].mxu1  ;;  %3711 = vmatprep.subr.bf16.mxu1 %v5734_v59  ;;  %3834 = vmatprep.subr.bf16.mxu0 %v5737_v60  ;;  %v2561_v49 = vadd.f32 1.0, %v5951_v50  ;;  %v5785_v57 = vld [vmem:[#allocation7 + $0x444] ss:$20 sps:$4 sm:$0xff]   ;;  %v5783_v60 = vld [vmem:[#allocation7 + $0x440] ss:$20 sps:$4 sm:$0xff]  }
 0x218   :  { %v5168_v4 = vpop.f32.mrb[13].mxu1  ;;  %3737 = vmatprep.mubr.bf16.mxu1 %v6307_v63  ;;  %3860 = vmatprep.mubr.bf16.mxu0 %v6307_v63  ;;  %v5780_v59 = vld [vmem:[#allocation7 + $0x438] ss:$20 sps:$4 sm:$0xff]   ;;  %v2564_v47 = vmul.f32 -0.5, %v5951_v50 }
 0x219   :  { %v2515_v5 = vpop.f32.mrb[14].mxu1  ;;  %5952 = vlog2.f32 %v2561_v49  ;;  %v5788_v61 = vld [vmem:[#allocation7 + $0x464] ss:$20 sps:$4 sm:$0xff]   ;;  %v5797_v4 = vld [vmem:[#allocation7 + $0x494] ss:$20 sps:$4 sm:$0xff]  }
 0x21a   :  { %v5169_v6 = vpop.f32.mrb[15].mxu1  ;;  %3712 = vmatpush1.bf16.msra.mxu1 %v5732_v62  ;;  %3835 = vmatpush1.bf16.msra.mxu0 %v5735_v46  ;;  %v5791_v62 = vld [vmem:[#allocation7 + $0x46c] ss:$20 sps:$4 sm:$0xff]   ;;  %v2565_v7 = vadd.f32 1.0, %v2564_v47  ;;  %v5830_v49 = vld [vmem:[#allocation7 + $0x57c] ss:$20 sps:$4 sm:$0xff]  }
 0x21b   :  { %3713 = vmatprep.subr.bf16.mxu1 %v5740_v2  ;;  %3836 = vmatprep.subr.bf16.mxu0 %v5743_v3  ;;  %v5789_v2 = vld [vmem:[#allocation7 + $0x468] ss:$20 sps:$4 sm:$0xff]   ;;  %v5794_v3 = vld [vmem:[#allocation7 + $0x48c] ss:$20 sps:$4 sm:$0xff]  }
 0x21c   :  { %v5792_v6 = vld [vmem:[#allocation7 + $0x488] ss:$20 sps:$4 sm:$0xff]  }
 0x21d   :  { %v5840_v47 = vld [vmem:[#allocation7 + $0x5c8] ss:$20 sps:$4 sm:$0xff]  }
 0x21e   :  { %3714 = vmatpush1.bf16.msra.mxu1 %v5738_v8  ;;  %3837 = vmatpush1.bf16.msra.mxu0 %v5741_v9  ;;  %v5050_v16 = vpop.f32.mrb[8].mxu0  ;;  %v5795_v9 = vld [vmem:[#allocation7 + $0x490] ss:$20 sps:$4 sm:$0xff]  }
 0x21f   :  { %3715 = vmatprep.subr.bf16.mxu1 %v5746_v10  ;;  %3838 = vmatprep.subr.bf16.mxu0 %v5749_v11  ;;  %v5051_v17 = vpop.f32.mrb[9].mxu0  ;;  %v2567_v10 = vand.u32 2147483647, %v5951_v50  ;;  %v5800_v11 = vld [vmem:[#allocation7 + $0x4b4] ss:$20 sps:$4 sm:$0xff]  }
 0x220   :  { %v5052_v13 = vadd.f32 %v5051_v17, %v5050_v16  ;;  %v5053_v24 = vpop.f32.mrb[10].mxu0  ;;  %v5798_v16 = vld [vmem:[#allocation7 + $0x4b0] ss:$20 sps:$4 sm:$0xff]   ;;  %v5801_v17 = vld [vmem:[#allocation7 + $0x4b8] ss:$20 sps:$4 sm:$0xff]  }
 0x221   :  { %v5054_v31 = vpop.f32.mrb[11].mxu0  ;;  %vm2568_vm5 = vcmp.lt.f32.partialorder %v2567_v10, 0.0004427343  ;;  %v2520_v24 = vmax.f32 %v6305_v55, 0.0 }
 0x222   :  { %3716 = vmatpush1.bf16.msra.mxu1 %v5744_v12  ;;  %3839 = vmatpush1.bf16.msra.mxu0 %v5747_v15  ;;  %v2473_v34 = vadd.f32 %v5052_v13, %v2433_v58  ;;  %v5803_v12 = vld [vmem:[#allocation7 + $0x4bc] ss:$20 sps:$4 sm:$0xff]   ;;  %v2566_v15 = vmul.f32 %v5951_v50, %v2565_v7  ;;  %v5804_v31 = vld [vmem:[#allocation7 + $0x4d8] ss:$20 sps:$4 sm:$0xff]  }
 0x223   :  { %3717 = vmatprep.subr.bf16.mxu1 %v5752_v21  ;;  %3840 = vmatprep.subr.bf16.mxu0 %v5755_v22  ;;  %v5953_v5 = vpop.eup %5952  ;;  %v5806_v21 = vld [vmem:[#allocation7 + $0x4dc] ss:$20 sps:$4 sm:$0xff]   ;;  %v5809_v22 = vld [vmem:[#allocation7 + $0x4e4] ss:$20 sps:$4 sm:$0xff]  }
 0x224   :  { %v6312_v38 = vadd.f32 %v2512_v1, %v2473_v34  ;;  %v5786_v1 = vld [vmem:[#allocation7 + $0x460] ss:$20 sps:$4 sm:$0xff]   ;;  %v2563_v14 = vmul.f32 0.6931472, %v5953_v5  ;;  %v5812_v34 = vld [vmem:[#allocation7 + $0x504] ss:$20 sps:$4 sm:$0xff]  }
 0x225   :  { %v5827_v50 = vld [vmem:[#allocation7 + $0x55c] ss:$20 sps:$4 sm:$0xff]   ;;  %v5849_v7 = vld [vmem:[#allocation7 + $0x5f8] ss:$20 sps:$4 sm:$0xff]  }
 0x226   :  { %3718 = vmatpush1.bf16.msra.mxu1 %v5750_v18  ;;  %3841 = vmatpush1.bf16.msra.mxu0 %v5753_v32  ;;  %v2527_v58 = vand.u32 2147483647, %v6312_v38  ;;  %v2569_v13 = vsel %vm2568_vm5, %v2566_v15, %v2563_v14  ;;  %v5807_v18 = vld [vmem:[#allocation7 + $0x4e0] ss:$20 sps:$4 sm:$0xff]  }
 0x227   :  { %3719 = vmatprep.subr.bf16.mxu1 %v5758_v36  ;;  %3842 = vmatprep.subr.bf16.mxu0 %v5761_v37  ;;  %v2590_v32 = vadd.f32 %v2569_v13, %v2520_v24  ;;  %v5815_v36 = vld [vmem:[#allocation7 + $0x50c] ss:$20 sps:$4 sm:$0xff]   ;;  %v5861_v13 = vld [vmem:[#allocation7 + $0x290] ss:$20 sps:$4 sm:$0xff]  }
 0x228   :  { %v2532_v46 = vsub.f32 0.0, %v2527_v58  ;;  %v5810_v37 = vld [vmem:[#allocation7 + $0x500] ss:$20 sps:$4 sm:$0xff]   ;;  %v5837_v58 = vld [vmem:[#allocation7 + $0x5a8] ss:$20 sps:$4 sm:$0xff]  }
 0x229   :  { %v5855_v14 = vld [vmem:[#allocation7 + $0x620] ss:$20 sps:$4 sm:$0xff]   ;;  %v5862_v24 = vld [vmem:[#allocation7 + $0x178] ss:$20 sps:$4 sm:$0xff]  }
 0x22a   :  { %3720 = vmatpush1.bf16.msra.mxu1 %v5756_v39  ;;  %3843 = vmatpush1.bf16.msra.mxu0 %v5759_v23  ;;  %v2541_v8 = vmul.f32 1.442695, %v2532_v46  ;;  %v5813_v39 = vld [vmem:[#allocation7 + $0x508] ss:$20 sps:$4 sm:$0xff]   ;;  %v6316_v23 = vpack.c.bf16 %v2590_v32, %v2590_v32  ;;  %v5843_v46 = vld [vmem:[#allocation7 + $0x5d0] ss:$20 sps:$4 sm:$0xff]  }
 0x22b   :  { %3721 = vmatprep.subr.bf16.mxu1 %v5764_v52  ;;  %3844 = vmatprep.subr.bf16.mxu0 %v5767_v40  ;;  %v5818_v52 = vld [vmem:[#allocation7 + $0x52c] ss:$20 sps:$4 sm:$0xff]   ;;  %v5821_v40 = vld [vmem:[#allocation7 + $0x534] ss:$20 sps:$4 sm:$0xff]  }
 0x22c   :  { %5954 = vpow2.f32 %v2541_v8  ;;  %v5854_v8 = vld [vmem:[#allocation7 + $0x61c] ss:$20 sps:$4 sm:$0xff]   ;;  %v5866_v32 = vld [vmem:[#allocation7 + $0x1a0] ss:$20 sps:$4 sm:$0xff]  }
 0x22e   :  { %3722 = vmatpush1.bf16.msra.mxu1 %v5762_v41  ;;  %3845 = vmatpush1.bf16.msra.mxu0 %v5765_v42  ;;  %v5816_v41 = vld [vmem:[#allocation7 + $0x528] ss:$20 sps:$4 sm:$0xff]   ;;  %v5819_v42 = vld [vmem:[#allocation7 + $0x530] ss:$20 sps:$4 sm:$0xff]  }
 0x22f   :  { %3723 = vmatprep.subr.bf16.mxu1 %v5770_v43  ;;  %3846 = vmatprep.subr.bf16.mxu0 %v5773_v45  ;;  %v5824_v45 = vld [vmem:[#allocation7 + $0x554] ss:$20 sps:$4 sm:$0xff]  }
 0x232   :  { %3724 = vmatpush1.bf16.msra.mxu1 %v5768_v54  ;;  %3847 = vmatpush1.bf16.msra.mxu0 %v5771_v48  ;;  %v5822_v54 = vld [vmem:[#allocation7 + $0x550] ss:$20 sps:$4 sm:$0xff]   ;;  %v5825_v48 = vld [vmem:[#allocation7 + $0x558] ss:$20 sps:$4 sm:$0xff]  }
 0x233   :  { %3725 = vmatprep.subr.bf16.mxu1 %v5776_v51  ;;  %3848 = vmatprep.subr.bf16.mxu0 %v5779_v53  ;;  %v5833_v51 = vld [vmem:[#allocation7 + $0x584] ss:$20 sps:$4 sm:$0xff]  }
 0x234   :  { %v5828_v53 = vld [vmem:[#allocation7 + $0x578] ss:$20 sps:$4 sm:$0xff]  }
 0x236   :  { %3726 = vmatpush1.bf16.msra.mxu1 %v5774_v28  ;;  %3849 = vmatpush1.bf16.msra.mxu0 %v5777_v35  ;;  %v5955_v55 = vpop.eup %5954  ;;  %v5831_v28 = vld [vmem:[#allocation7 + $0x580] ss:$20 sps:$4 sm:$0xff]   ;;  %v5836_v35 = vld [vmem:[#allocation7 + $0x5a4] ss:$20 sps:$4 sm:$0xff]  }
 0x237   :  { %3727 = vmatprep.subr.bf16.mxu1 %v5782_v56  ;;  %3850 = vmatprep.subr.bf16.mxu0 %v5785_v57  ;;  %v2579_v43 = vadd.f32 1.0, %v5955_v55  ;;  %v5839_v56 = vld [vmem:[#allocation7 + $0x5ac] ss:$20 sps:$4 sm:$0xff]   ;;  %v2582_v57 = vmul.f32 -0.5, %v5955_v55 }
 0x239   :  { %5956 = vlog2.f32 %v2579_v43  ;;  %v5878_v43 = vld [vmem:[#allocation7 + $0x218] ss:$20 sps:$4 sm:$0xff]  }
 0x23a   :  { %3728 = vmatpush1.bf16.msra.mxu1 %v5780_v59  ;;  %3851 = vmatpush1.bf16.msra.mxu0 %v5783_v60  ;;  %v5842_v59 = vld [vmem:[#allocation7 + $0x5cc] ss:$20 sps:$4 sm:$0xff]   ;;  %v5845_v60 = vld [vmem:[#allocation7 + $0x5d4] ss:$20 sps:$4 sm:$0xff]  }
 0x23b   :  { %3729 = vmatprep.subr.bf16.mxu1 %v5788_v61  ;;  %3852 = vmatprep.subr.bf16.mxu0 %v5791_v62  ;;  %v2583_v62 = vadd.f32 1.0, %v2582_v57  ;;  %v5889_v57 = vld [vmem:[#allocation7 + $0x3a8] ss:$20 sps:$4 sm:$0xff]  }
 0x23d   :  { %v2584_v5 = vmul.f32 %v5955_v55, %v2583_v62  ;;  %v5897_v62 = vld [vmem:[#allocation7 + $0x628] ss:$20 sps:$4 sm:$0xff]  }
 0x23e   :  { %3730 = vmatpush1.bf16.msra.mxu1 %v5786_v1  ;;  %3853 = vmatpush1.bf16.msra.mxu0 %v5789_v2  ;;  %v2585_v1 = vand.u32 2147483647, %v5955_v55  ;;  %v5848_v2 = vld [vmem:[#allocation7 + $0x5f4] ss:$20 sps:$4 sm:$0xff]   ;;  %v5874_v55 = vld [vmem:[#allocation7 + $0x1f0] ss:$20 sps:$4 sm:$0xff]  }
 0x23f   :  { %3731 = vmatprep.subr.bf16.mxu1 %v5794_v3  ;;  %3854 = vmatprep.subr.bf16.mxu0 %v5797_v4  ;;  %v5851_v3 = vld [vmem:[#allocation7 + $0x5fc] ss:$20 sps:$4 sm:$0xff]  }
 0x240   :  { %vm2586_vm6 = vcmp.lt.f32.partialorder %v2585_v1, 0.0004427343  ;;  %v5900_v1 = vld [vmem:[#allocation8] sm:$0xff]  }
 0x242   :  { %3732 = vmatpush1.bf16.msra.mxu1 %v5792_v6  ;;  %3855 = vmatpush1.bf16.msra.mxu0 %v5795_v9  ;;  %v5846_v6 = vld [vmem:[#allocation7 + $0x5f0] ss:$20 sps:$4 sm:$0xff]  }
 0x243   :  { %3733 = vmatprep.subr.bf16.mxu1 %v5800_v11  ;;  %3856 = vmatprep.subr.bf16.mxu0 %v5803_v12  ;;  %v5957_v61 = vpop.eup %5956  ;;  %v5857_v9 = vld [vmem:[#allocation7 + $0x624] ss:$20 sps:$4 sm:$0xff]   ;;  %v2522_v11 = vmax.f32 %v6312_v38, 0.0 }
 0x244   :  { %v2581_v4 = vmul.f32 0.6931472, %v5957_v61  ;;  %v5852_v12 = vld [vmem:[#allocation7 + $0x618] ss:$20 sps:$4 sm:$0xff]   ;;  %v5894_v61 = vld [vmem:[#allocation7 + $0x5b0] ss:$20 sps:$4 sm:$0xff]  }
 0x245   :  { %v5864_v38 = vld [vmem:[#allocation7 + $0x38] ss:$20 sps:$4 sm:$0xff]  }
 0x246   :  { %3734 = vmatpush1.bf16.msra.mxu1 %v5798_v16  ;;  %3857 = vmatpush1.bf16.msra.mxu0 %v5801_v17  ;;  %v2587_v10 = vsel %vm2586_vm6, %v2584_v5, %v2581_v4  ;;  %v5858_v16 = vld [vmem:[#allocation7 + $0x150] ss:$20 sps:$4 sm:$0xff]   ;;  %v5903_v4 = vld [vmem:[#allocation8 + $0xc8] sm:$0xff]  }
 0x247   :  { %3735 = vmatprep.subr.bf16.mxu1 %v5806_v21  ;;  %3858 = vmatprep.subr.bf16.mxu0 %v5809_v22  ;;  %v2592_v15 = vadd.f32 %v2587_v10, %v2522_v11  ;;  %v5859_v17 = vld [vmem:[#allocation7 + $0x3d0] ss:$20 sps:$4 sm:$0xff]   ;;  %v5904_v5 = vld [vmem:[#allocation8 + $0x8] sm:$0xff]   ;;  %v5910_v11 = vld [vmem:[#allocation8 + $0x58] sm:$0xff]  }
 0x248   :  { %v5860_v21 = vld [vmem:[#allocation7 + $0x10] ss:$20 sps:$4 sm:$0xff]  }
 0x249   :  { %v6323_v22 = vpack.c.bf16 %v2592_v15, %v2592_v15  ;;  %v5909_v10 = vld [vmem:[#allocation8 + $0x90] sm:$0xff]   ;;  %v5913_v15 = vld [vmem:[#allocation8 + $0x98] sm:$0xff]  }
 0x24a   :  { %3736 = vmatpush1.bf16.msra.mxu1 %v5804_v31  ;;  %3859 = vmatpush1.bf16.msra.mxu0 %v5807_v18  ;;  %v5863_v31 = vld [vmem:[#allocation7 + $0x3f8] ss:$20 sps:$4 sm:$0xff]  }
 0x24b   :  { %3746 = vmatprep.subr.bf16.mxu1 %v5812_v34  ;;  %3869 = vmatprep.subr.bf16.mxu0 %v5815_v36  ;;  %v5865_v18 = vld [vmem:[#allocation7 + $0x2b8] ss:$20 sps:$4 sm:$0xff]   ;;  %v5867_v34 = vld [vmem:[#allocation7 + $0x420] ss:$20 sps:$4 sm:$0xff]  }
 0x24c   :  { %v5868_v36 = vld [vmem:[#allocation7 + $0x60] ss:$20 sps:$4 sm:$0xff]  }
 0x24d   :  { %3738 = vmatmul.mubr.bf16.vlgmr.msra.gmra.mrb[16].mxu1 %v6316_v23  ;;  %3861 = vmatmul.mubr.bf16.vlgmr.msra.gmra.mrb[12].mxu0 %v6316_v23 }
 0x24e   :  { %3747 = vmatpush1.bf16.msra.mxu1 %v5810_v37  ;;  %3870 = vmatpush1.bf16.msra.mxu0 %v5813_v39  ;;  %v5869_v37 = vld [vmem:[#allocation7 + $0x2e0] ss:$20 sps:$4 sm:$0xff]   ;;  %v5870_v39 = vld [vmem:[#allocation7 + $0x1c8] ss:$20 sps:$4 sm:$0xff]  }
 0x24f   :  { %3748 = vmatprep.subr.bf16.mxu1 %v5818_v52  ;;  %3871 = vmatprep.subr.bf16.mxu0 %v5821_v40  ;;  %v5871_v52 = vld [vmem:[#allocation7 + $0x448] ss:$20 sps:$4 sm:$0xff]  }
 0x250   :  { %3778 = vmatprep.mubr.bf16.mxu1 %v6105_v0  ;;  %3901 = vmatprep.mubr.bf16.mxu0 %v6105_v0  ;;  %v5834_v0 = vld [vmem:[#allocation7 + $0x5a0] ss:$20 sps:$4 sm:$0xff]   ;;  %v5872_v40 = vld [vmem:[#allocation7 + $0x88] ss:$20 sps:$4 sm:$0xff]  }
 0x252   :  { %3749 = vmatpush1.bf16.msra.mxu1 %v5816_v41  ;;  %3872 = vmatpush1.bf16.msra.mxu0 %v5819_v42  ;;  %v5876_v41 = vld [vmem:[#allocation7 + $0xb0] ss:$20 sps:$4 sm:$0xff]  }
 0x253   :  { %3750 = vmatprep.subr.bf16.mxu1 %v5824_v45  ;;  %3873 = vmatprep.subr.bf16.mxu0 %v5827_v50  ;;  %v5877_v42 = vld [vmem:[#allocation7 + $0x330] ss:$20 sps:$4 sm:$0xff]   ;;  %v5879_v45 = vld [vmem:[#allocation7 + $0x498] ss:$20 sps:$4 sm:$0xff]  }
 0x254   :  { %v5880_v50 = vld [vmem:[#allocation7 + $0xd8] ss:$20 sps:$4 sm:$0xff]  }
 0x256   :  { %3751 = vmatpush1.bf16.msra.mxu1 %v5822_v54  ;;  %3874 = vmatpush1.bf16.msra.mxu0 %v5825_v48  ;;  %v5881_v54 = vld [vmem:[#allocation7 + $0x358] ss:$20 sps:$4 sm:$0xff]   ;;  %v5882_v48 = vld [vmem:[#allocation7 + $0x240] ss:$20 sps:$4 sm:$0xff]  }
 0x257   :  { %3752 = vmatprep.subr.bf16.mxu1 %v5830_v49  ;;  %3875 = vmatprep.subr.bf16.mxu0 %v5833_v51  ;;  %v5883_v49 = vld [vmem:[#allocation7 + $0x4c0] ss:$20 sps:$4 sm:$0xff]  }
 0x258   :  { %v5884_v51 = vld [vmem:[#allocation7 + $0x100] ss:$20 sps:$4 sm:$0xff]  }
 0x25a   :  { %3753 = vmatpush1.bf16.msra.mxu1 %v5828_v53  ;;  %3876 = vmatpush1.bf16.msra.mxu0 %v5831_v28  ;;  %v5885_v53 = vld [vmem:[#allocation7 + $0x380] ss:$20 sps:$4 sm:$0xff]   ;;  %v5886_v28 = vld [vmem:[#allocation7 + $0x268] ss:$20 sps:$4 sm:$0xff]  }
 0x25b   :  { %3754 = vmatprep.subr.bf16.mxu1 %v5836_v35  ;;  %3877 = vmatprep.subr.bf16.mxu0 %v5839_v56  ;;  %v5887_v35 = vld [vmem:[#allocation7 + $0x4e8] ss:$20 sps:$4 sm:$0xff]  }
 0x25c   :  { %v5888_v56 = vld [vmem:[#allocation7 + $0x128] ss:$20 sps:$4 sm:$0xff]  }
 0x25e   :  { %3755 = vmatpush1.bf16.msra.mxu1 %v5834_v0  ;;  %3878 = vmatpush1.bf16.msra.mxu0 %v5837_v58  ;;  %v5890_v0 = vld [vmem:[#allocation7 + $0x510] ss:$20 sps:$4 sm:$0xff]   ;;  %v5891_v58 = vld [vmem:[#allocation7 + $0x538] ss:$20 sps:$4 sm:$0xff]  }
 0x25f   :  { %3756 = vmatprep.subr.bf16.mxu1 %v5842_v59  ;;  %3879 = vmatprep.subr.bf16.mxu0 %v5845_v60  ;;  %v5892_v59 = vld [vmem:[#allocation7 + $0x560] ss:$20 sps:$4 sm:$0xff]   ;;  %v5893_v60 = vld [vmem:[#allocation7 + $0x588] ss:$20 sps:$4 sm:$0xff]  }
 0x262   :  { %3757 = vmatpush1.bf16.msra.mxu1 %v5840_v47  ;;  %3880 = vmatpush1.bf16.msra.mxu0 %v5843_v46  ;;  %v5898_v47 = vld [vmem:[#allocation8 + $0x40] sm:$0xff]  }
 0x263   :  { %3758 = vmatprep.subr.bf16.mxu1 %v5848_v2  ;;  %3881 = vmatprep.subr.bf16.mxu0 %v5851_v3  ;;  %v5899_v46 = vld [vmem:[#allocation8 + $0xc0] sm:$0xff]   ;;  %v5902_v3 = vld [vmem:[#allocation8 + $0x48] sm:$0xff]  }
 0x264   :  { %v5901_v2 = vld [vmem:[#allocation8 + $0x80] sm:$0xff]  }
 0x266   :  { %3759 = vmatpush1.bf16.msra.mxu1 %v5846_v6  ;;  %3882 = vmatpush1.bf16.msra.mxu0 %v5849_v7  ;;  %v5905_v6 = vld [vmem:[#allocation8 + $0x88] sm:$0xff]   ;;  %v5906_v7 = vld [vmem:[#allocation8 + $0x50] sm:$0xff]  }
 0x267   :  { %3760 = vmatprep.subr.bf16.mxu1 %v5854_v8  ;;  %3883 = vmatprep.subr.bf16.mxu0 %v5857_v9  ;;  %v5907_v8 = vld [vmem:[#allocation8 + $0xd0] sm:$0xff]  }
 0x268   :  { %v5908_v9 = vld [vmem:[#allocation8 + $0x10] sm:$0xff]  }
 0x26a   :  { %3761 = vmatpush1.bf16.msra.mxu1 %v5852_v12  ;;  %3884 = vmatpush1.bf16.msra.mxu0 %v5855_v14  ;;  %v5911_v12 = vld [vmem:[#allocation8 + $0xd8] sm:$0xff]  }
 0x26b   :  { %5058 = vmatprep.subr.bf16.mxu1 %v5858_v16  ;;  %5080 = vmatprep.subr.bf16.mxu0 %v5859_v17  ;;  %v5912_v14 = vld [vmem:[#allocation8 + $0x18] sm:$0xff]   ;;  %v5914_v16 = vld [vmem:[#allocation8 + $0x60] sm:$0xff]  }
 0x26c   :  { %v5915_v17 = vld [vmem:[#allocation8 + $0xe0] sm:$0xff]  }
 0x26d   :  { %3779 = vmatmul.mubr.bf16.vlgmr.msra.gmra.mrb[16].mxu1 %v6323_v22  ;;  %3902 = vmatmul.mubr.bf16.vlgmr.msra.gmra.mrb[12].mxu0 %v6323_v22 }
 0x26e   :  { %5059 = vmatpush3.bf16.msra.mxu1 %v5860_v21  ;;  %3942 = vmatprep.mubr.bf16.mxu1 %v6289_v30  ;;  %v5873_v30 = vld [vmem:[#allocation7 + $0x308] ss:$20 sps:$4 sm:$0xff]   ;;  %v5916_v21 = vld [vmem:[#allocation8 + $0x20] sm:$0xff]  }
 0x26f   :  { %5081 = vmatpush3.bf16.msra.mxu0 %v5861_v13  ;;  %3982 = vmatprep.mubr.bf16.mxu0 %v6307_v63  ;;  %v5875_v63 = vld [vmem:[#allocation7 + $0x470] ss:$20 sps:$4 sm:$0xff]   ;;  %v5918_v13 = vld [vmem:[#allocation8 + $0x68] sm:$0xff]  }
 0x270   :  { %5060 = vmatprep.subr.bf16.mxu1 %v5862_v24  ;;  %5082 = vmatprep.subr.bf16.mxu0 %v5863_v31  ;;  %v5919_v24 = vld [vmem:[#allocation8 + $0xe8] sm:$0xff]  }
 0x271   :  { %v5920_v31 = vld [vmem:[#allocation8 + $0x28] sm:$0xff]  }
 0x272   :  { %5061 = vmatpush3.bf16.msra.mxu1 %v5864_v38  ;;  %v5921_v38 = vld [vmem:[#allocation8 + $0xa8] sm:$0xff]  }
 0x273   :  { %5083 = vmatpush3.bf16.msra.mxu0 %v5865_v18  ;;  %5062 = vmatprep.subr.bf16.mxu1 %v5866_v32  ;;  %v5922_v18 = vld [vmem:[#allocation8 + $0x70] sm:$0xff]  }
 0x274   :  { %5084 = vmatprep.subr.bf16.mxu0 %v5867_v34  ;;  %v5923_v32 = vld [vmem:[#allocation8 + $0xf0] sm:$0xff]  }
 0x275   :  { %v5924_v34 = vld [vmem:[#allocation8 + $0x30] sm:$0xff]  }
 0x276   :  { %5063 = vmatpush3.bf16.msra.mxu1 %v5868_v36  ;;  %v5925_v36 = vld [vmem:[#allocation8 + $0xb0] sm:$0xff]  }
 0x277   :  { %5085 = vmatpush3.bf16.msra.mxu0 %v5869_v37  ;;  %5064 = vmatprep.subr.bf16.mxu1 %v5870_v39  ;;  %v5926_v37 = vld [vmem:[#allocation8 + $0x78] sm:$0xff]  }
 0x278   :  { %5086 = vmatprep.subr.bf16.mxu0 %v5871_v52  ;;  %v5927_v39 = vld [vmem:[#allocation8 + $0xf8] sm:$0xff]  }
 0x279   :  { %v5928_v52 = vld [vmem:[#allocation8 + $0x38] sm:$0xff]  }
 0x27a   :  { %5065 = vmatpush3.bf16.msra.mxu1 %v5872_v40  ;;  %v5929_v40 = vld [vmem:[#allocation8 + $0xb8] sm:$0xff]  }
 0x27b   :  { %5087 = vmatpush3.bf16.msra.mxu0 %v5873_v30  ;;  %5066 = vmatprep.subr.bf16.mxu1 %v5874_v55  ;;  %v696_v30 = vld [vmem:[%s6412_s4] sm:$0x1f] }
 0x27c   :  { %5088 = vmatprep.subr.bf16.mxu0 %v5875_v63  ;;  %v2602_v55 = vrot.slane %v696_v30, %v705_v27  ;;  %v2610_v63 = vrot.slane %v696_v30, %v713_v25 }
 0x27e   :  { %5067 = vmatpush3.bf16.msra.mxu1 %v5876_v41  ;;  %v2606_v41 = vrot.slane %v696_v30, %v709_v29 }
 0x27f   :  { %5089 = vmatpush3.bf16.msra.mxu0 %v5877_v42  ;;  %5068 = vmatprep.subr.bf16.mxu1 %v5878_v43  ;;  %v2614_v42 = vrot.slane %v696_v30, %v717_v44 }
 0x280   :  { %5090 = vmatprep.subr.bf16.mxu0 %v5879_v45 }
 0x282   :  { %5069 = vmatpush3.bf16.msra.mxu1 %v5880_v50 }
 0x283   :  { %5091 = vmatpush3.bf16.msra.mxu0 %v5881_v54  ;;  %5070 = vmatprep.subr.bf16.mxu1 %v5882_v48 }
 0x284   :  { %5092 = vmatprep.subr.bf16.mxu0 %v5883_v49 }
 0x286   :  { %5071 = vmatpush3.bf16.msra.mxu1 %v5884_v51 }
 0x287   :  { %5093 = vmatpush3.bf16.msra.mxu0 %v5885_v53  ;;  %5072 = vmatprep.subr.bf16.mxu1 %v5886_v28 }
 0x288   :  { %5094 = vmatprep.subr.bf16.mxu0 %v5887_v35 }
 0x28a   :  { %5073 = vmatpush3.bf16.msra.mxu1 %v5888_v56 }
 0x28b   :  { %5095 = vmatpush3.bf16.msra.mxu0 %v5889_v57  ;;  %5170 = vmatprep.subr.bf16.mxu1 %v6106_v20 }
 0x28c   :  { %5111 = vmatprep.subr.bf16.mxu0 %v5898_v47 }
 0x28d   :  { %3943 = vmatmul.mubr.bf16.vlgmr.msra.gmra.mrb[20].mxu1 %v6294_v33  ;;  %v5895_v33 = vld [vmem:[#allocation7 + $0x5d8] ss:$20 sps:$4 sm:$0xff]  }
 0x28e   :  { %3983 = vmatmul.mubr.bf16.vlgmr.msra.gmra.mrb[16].mxu0 %v6316_v23  ;;  %5171 = vmatpush3.bf16.msra.mxu1 %v5890_v0  ;;  %v5896_v23 = vld [vmem:[#allocation7 + $0x600] ss:$20 sps:$4 sm:$0xff]  }
 0x28f   :  { %5172 = vmatprep.subr.bf16.mxu1 %v6106_v20  ;;  %5186 = vmatprep.mubr.msk.bf16.mxu1 %vm6107_vm1, %v6106_v20 }
 0x290   :  { %5112 = vmatpush3.bf16.msra.mxu0 %v5900_v1 }
 0x291   :  { %5113 = vmatprep.subr.bf16.mxu0 %v5902_v3 }
 0x292   :  { %5173 = vmatpush3.bf16.msra.mxu1 %v5891_v58 }
 0x293   :  { %5174 = vmatprep.subr.bf16.mxu1 %v6106_v20 }
 0x294   :  { %5114 = vmatpush3.bf16.msra.mxu0 %v5904_v5 }
 0x295   :  { %5115 = vmatprep.subr.bf16.mxu0 %v5906_v7 }
 0x296   :  { %5175 = vmatpush3.bf16.msra.mxu1 %v5892_v59 }
 0x297   :  { %5176 = vmatprep.subr.bf16.mxu1 %v6106_v20 }
 0x298   :  { %5116 = vmatpush3.bf16.msra.mxu0 %v5908_v9 }
 0x299   :  { %5117 = vmatprep.subr.bf16.mxu0 %v5910_v11 }
 0x29a   :  { %5177 = vmatpush3.bf16.msra.mxu1 %v5893_v60 }
 0x29b   :  { %5178 = vmatprep.subr.bf16.mxu1 %v6106_v20 }
 0x29c   :  { %5118 = vmatpush3.bf16.msra.mxu0 %v5912_v14 }
 0x29d   :  { %5119 = vmatprep.subr.bf16.mxu0 %v5914_v16 }
 0x29e   :  { %5179 = vmatpush3.bf16.msra.mxu1 %v5894_v61 }
 0x29f   :  { %5180 = vmatprep.subr.bf16.mxu1 %v6106_v20 }
 0x2a0   :  { %5120 = vmatpush3.bf16.msra.mxu0 %v5916_v21 }
 0x2a1   :  { %5121 = vmatprep.subr.bf16.mxu0 %v5918_v13 }
 0x2a2   :  { %5181 = vmatpush3.bf16.msra.mxu1 %v5895_v33 }
 0x2a3   :  { %5182 = vmatprep.subr.bf16.mxu1 %v6106_v20 }
 0x2a4   :  { %5122 = vmatpush3.bf16.msra.mxu0 %v5920_v31  ;;  %v2618_v31 = vrot.slane %v696_v30, %v721_v19 }
 0x2a5   :  { %5123 = vmatprep.subr.bf16.mxu0 %v5922_v18 }
 0x2a6   :  { %5183 = vmatpush3.bf16.msra.mxu1 %v5896_v23 }
 0x2a7   :  { %5184 = vmatprep.subr.bf16.mxu1 %v6106_v20 }
 0x2a8   :  { %5124 = vmatpush3.bf16.msra.mxu0 %v5924_v34 }
 0x2a9   :  { %5125 = vmatprep.subr.bf16.mxu0 %v5926_v37 }
 0x2aa   :  { %5185 = vmatpush3.bf16.msra.mxu1 %v5897_v62 }
 0x2ab   :  { %5133 = vmatprep.subr.bf16.mxu1 %v5899_v46 }
 0x2ac   :  { %5126 = vmatpush3.bf16.msra.mxu0 %v5928_v52 }
 0x2ad   :  { %5187 = vmatmul.mubr.bf16.vlgmr.msra.gmra.mrb[24].mxu1 %v6323_v22  ;;  %v5917_v22 = vld [vmem:[#allocation8 + $0xa0] sm:$0xff]   ;;  %5190 = vmatprep.subr.bf16.mxu0 %v6106_v20 }
 0x2ae   :  { %5134 = vmatpush3.bf16.msra.mxu1 %v5901_v2 }
 0x2af   :  { %5135 = vmatprep.subr.bf16.mxu1 %v5903_v4 }
 0x2b2   :  { %5136 = vmatpush3.bf16.msra.mxu1 %v5905_v6 }
 0x2b3   :  { %5137 = vmatprep.subr.bf16.mxu1 %v5907_v8 }
 0x2b6   :  { %5138 = vmatpush3.bf16.msra.mxu1 %v5909_v10 }
 0x2b7   :  { %5139 = vmatprep.subr.bf16.mxu1 %v5911_v12 }
 0x2ba   :  { %5140 = vmatpush3.bf16.msra.mxu1 %v5913_v15 }
 0x2bb   :  { %5141 = vmatprep.subr.bf16.mxu1 %v5915_v17 }
 0x2be   :  { %5142 = vmatpush3.bf16.msra.mxu1 %v5917_v22 }
 0x2bf   :  { %5143 = vmatprep.subr.bf16.mxu1 %v5919_v24 }
 0x2c2   :  { %5144 = vmatpush3.bf16.msra.mxu1 %v5921_v38 }
 0x2c3   :  { %5145 = vmatprep.subr.bf16.mxu1 %v5923_v32 }
 0x2c6   :  { %5146 = vmatpush3.bf16.msra.mxu1 %v5925_v36 }
 0x2c7   :  { %5147 = vmatprep.subr.bf16.mxu1 %v5927_v39 }
 0x2ca   :  { %5148 = vmatpush3.bf16.msra.mxu1 %v5929_v40 }
 0x340   :  { %v3780_v43 = vpop.f32.mrb[16].mxu1  ;;  %v3903_v45 = vpop.f32.mrb[12].mxu0 }
 0x341   :  { %v6354_v50 = vadd.f32 %v3780_v43, %v2602_v55  ;;  %v6356_v54 = vadd.f32 %v3903_v45, %v2610_v63  ;;  %v3782_v48 = vpop.f32.mrb[17].mxu1  ;;  %v3905_v49 = vpop.f32.mrb[13].mxu0 }
 0x342   :  { %v6358_v51 = vadd.f32 %v3782_v48, %v2606_v41  ;;  %v6360_v27 = vadd.f32 %v3905_v49, %v2614_v42  ;;  %v3784_v53 = vpop.f32.mrb[18].mxu1  ;;  %v3907_v25 = vpop.f32.mrb[14].mxu0 }
 0x343   :  { %v4035_v28 = vand.u32 2147483647, %v6354_v50  ;;  %v4037_v29 = vand.u32 2147483647, %v6356_v54  ;;  %v3785_v0 = vpop.f32.mrb[19].mxu1  ;;  %v3908_v58 = vpop.f32.mrb[15].mxu0 }
 0x344   :  { %v4036_v44 = vand.u32 2147483647, %v6358_v51  ;;  %v4038_v35 = vand.u32 2147483647, %v6360_v27  ;;  %v4030_v22 = vmax.f32 %v6354_v50, 0.0  ;;  %v4032_v36 = vmax.f32 %v6356_v54, 0.0 }
 0x345   :  { %v4040_v56 = vsub.f32 0.0, %v4035_v28  ;;  %v4042_v57 = vsub.f32 0.0, %v4037_v29  ;;  %v4031_v25 = vmax.f32 %v6358_v51, 0.0  ;;  %v4033_v0 = vmax.f32 %v6360_v27, 0.0  ;;  %v5932_v27 = vld [vmem:[#allocation8 + $0x110] sm:$0xff]  }
 0x346   :  { %v4041_v59 = vsub.f32 0.0, %v4036_v44  ;;  %v4043_v60 = vsub.f32 0.0, %v4038_v35 }
 0x347   :  { %v4045_v61 = vmul.f32 1.442695, %v4040_v56  ;;  %v4049_v33 = vmul.f32 1.442695, %v4042_v57 }
 0x348   :  { %v4047_v23 = vmul.f32 1.442695, %v4041_v59  ;;  %v4051_v62 = vmul.f32 1.442695, %v4043_v60 }
 0x349   :  { %5958 = vpow2.f32 %v4045_v61 }
 0x34a   :  { %5960 = vpow2.f32 %v4049_v33 }
 0x34b   :  { %5962 = vpow2.f32 %v4047_v23 }
 0x34c   :  { %5964 = vpow2.f32 %v4051_v62  ;;  %v5930_v62 = vld [vmem:[#allocation8 + $0x100] sm:$0xff]  }
 0x353   :  { %v5959_v47 = vpop.eup %5958 }
 0x354   :  { %v5961_v46 = vpop.eup %5960  ;;  %v4055_v1 = vadd.f32 1.0, %v5959_v47  ;;  %v4058_v7 = vmul.f32 -0.5, %v5959_v47  ;;  %v4061_v9 = vand.u32 2147483647, %v5959_v47 }
 0x355   :  { %v5963_v2 = vpop.eup %5962  ;;  %v4073_v3 = vadd.f32 1.0, %v5961_v46  ;;  %v4076_v8 = vmul.f32 -0.5, %v5961_v46  ;;  %v4079_v11 = vand.u32 2147483647, %v5961_v46 }
 0x356   :  { %v5965_v4 = vpop.eup %5964  ;;  %5966 = vlog2.f32 %v4055_v1  ;;  %v4064_v5 = vadd.f32 1.0, %v5963_v2  ;;  %v4067_v10 = vmul.f32 -0.5, %v5963_v2  ;;  %v4059_v12 = vadd.f32 1.0, %v4058_v7  ;;  %v5931_v1 = vld [vmem:[#allocation8 + $0x108] sm:$0xff]  }
 0x357   :  { %5968 = vlog2.f32 %v4073_v3  ;;  %v4082_v6 = vadd.f32 1.0, %v5965_v4  ;;  %v4085_v14 = vmul.f32 -0.5, %v5965_v4  ;;  %v4077_v15 = vadd.f32 1.0, %v4076_v8  ;;  %v5934_v3 = vld [vmem:[#allocation8 + $0x120] sm:$0xff]  }
 0x358   :  { %5970 = vlog2.f32 %v4064_v5  ;;  %vm6366_vm7 = vcmp.lt.f32.partialorder %v4061_v9, 0.0004427343  ;;  %v4068_v17 = vadd.f32 1.0, %v4067_v10  ;;  %vm6371_vm8 = vcmp.lt.f32.partialorder %v4079_v11, 0.0004427343 }
 0x359   :  { %5972 = vlog2.f32 %v4082_v6  ;;  %v4070_v38 = vand.u32 2147483647, %v5963_v2  ;;  %v4060_v34 = vmul.f32 %v5959_v47, %v4059_v12  ;;  %v4086_v52 = vadd.f32 1.0, %v4085_v14  ;;  %v5936_v6 = vld [vmem:[#allocation8 + $0x130] sm:$0xff]   ;;  %v5937_v12 = vld [vmem:[#allocation8 + $0x138] sm:$0xff]  }
 0x35a   :  { %v4078_v63 = vmul.f32 %v5961_v46, %v4077_v15  ;;  %v4088_v45 = vand.u32 2147483647, %v5965_v4  ;;  %v4069_v49 = vmul.f32 %v5963_v2, %v4068_v17  ;;  %v5933_v2 = vld [vmem:[#allocation8 + $0x118] sm:$0xff]  }
 0x35b   :  { %vm4071_vm9 = vcmp.lt.f32.partialorder %v4070_v38, 0.0004427343  ;;  %v4087_v57 = vmul.f32 %v5965_v4, %v4086_v52  ;;  %v5935_v4 = vld [vmem:[#allocation8 + $0x128] sm:$0xff]  }
 0x35c   :  { %vm4089_vm10 = vcmp.lt.f32.partialorder %v4088_v45, 0.0004427343 }
 0x360   :  { %v5967_v21 = vpop.eup %5966  ;;  %v5074_v24 = vpop.f32.mrb[20].mxu1 }
 0x361   :  { %v5969_v18 = vpop.eup %5968  ;;  %v4057_v32 = vmul.f32 0.6931472, %v5967_v21  ;;  %v5096_v37 = vpop.f32.mrb[16].mxu0 }
 0x362   :  { %v5075_v39 = vpop.f32.mrb[21].mxu1  ;;  %v5971_v40 = vpop.eup %5970  ;;  %v4075_v55 = vmul.f32 0.6931472, %v5969_v18 }
 0x363   :  { %v5076_v41 = vadd.f32 %v5075_v39, %v5074_v24  ;;  %v5097_v42 = vpop.f32.mrb[17].mxu0  ;;  %v5077_v43 = vpop.f32.mrb[22].mxu1  ;;  %v4063_v26 = vsel %vm6366_vm7, %v4060_v34, %v4057_v32  ;;  %v4066_v48 = vmul.f32 0.6931472, %v5971_v40 }
 0x364   :  { %v5098_v19 = vadd.f32 %v5097_v42, %v5096_v37  ;;  %v5099_v30 = vpop.f32.mrb[18].mxu0  ;;  %v5078_v50 = vpop.f32.mrb[23].mxu1  ;;  %v4081_v54 = vsel %vm6371_vm8, %v4078_v63, %v4075_v55  ;;  %v4100_v44 = vadd.f32 %v4063_v26, %v4030_v22 }
 0x365   :  { %v5973_v53 = vpop.eup %5972  ;;  %v3945_v28 = vadd.f32 %v5076_v41, %v2618_v31  ;;  %v5100_v29 = vpop.f32.mrb[19].mxu0  ;;  %v4072_v35 = vsel %vm4071_vm9, %v4069_v49, %v4066_v48  ;;  %v4102_v60 = vadd.f32 %v4081_v54, %v4032_v36 }
 0x366   :  { %v4084_v56 = vmul.f32 0.6931472, %v5973_v53  ;;  %v4101_v58 = vadd.f32 %v4072_v35, %v4031_v25  ;;  %v4105_v47 = vpack.c.bf16 %v4100_v44, %v4100_v44 }
 0x367   :  { %v3985_v59 = vadd.f32 %v5098_v19, %v3945_v28  ;;  %v4107_v46 = vpack.c.bf16 %v4102_v60, %v4102_v60 }
 0x368   :  { %v4090_v61 = vsel %vm4089_vm10, %v4087_v57, %v4084_v56  ;;  %v4106_v33 = vpack.c.bf16 %v4101_v58, %v4101_v58 }
 0x369   :  { %v4103_v23 = vadd.f32 %v4090_v61, %v4033_v0 }
 0x36a   :  { %4388 = vmatprep.mubr.bf16.mxu0 %v4106_v33 }
 0x36b   :  { %v4108_v51 = vpack.c.bf16 %v4103_v23, %v4103_v23  ;;  %4389 = vmatmul.mubr.bf16.vlgmr.msra.gmra.mrb[20].mxu0 %v4105_v47 }
 0x36c   :  { %5191 = vmatpush3.bf16.msra.mxu0 %v5930_v62  ;;  %5206 = vmatprep.mubr.msk.bf16.mxu0 %vm6107_vm1, %v6106_v20 }
 0x36d   :  { %4428 = vmatprep.mubr.bf16.mxu1 %v4108_v51  ;;  %5192 = vmatprep.subr.bf16.mxu0 %v6106_v20 }
 0x36e   :  { %4429 = vmatmul.mubr.bf16.vlgmr.msra.gmra.mrb[28].mxu1 %v4107_v46 }
 0x370   :  { %5193 = vmatpush3.bf16.msra.mxu0 %v5931_v1 }
 0x371   :  { %5194 = vmatprep.subr.bf16.mxu0 %v6106_v20 }
 0x374   :  { %5195 = vmatpush3.bf16.msra.mxu0 %v5932_v27 }
 0x375   :  { %5196 = vmatprep.subr.bf16.mxu0 %v6106_v20 }
 0x378   :  { %5197 = vmatpush3.bf16.msra.mxu0 %v5933_v2 }
 0x379   :  { %5198 = vmatprep.subr.bf16.mxu0 %v6106_v20 }
 0x37c   :  { %5199 = vmatpush3.bf16.msra.mxu0 %v5934_v3 }
 0x37d   :  { %5200 = vmatprep.subr.bf16.mxu0 %v6106_v20 }
 0x380   :  { %v4024_v5 = vpop.f32.mrb[24].mxu1  ;;  %5201 = vmatpush3.bf16.msra.mxu0 %v5935_v4 }
 0x381   :  { %v4025_v7 = vadd.f32 %v4024_v5, %v3985_v59  ;;  %v5188_v8 = vpop.f32.mrb[25].mxu1  ;;  %5202 = vmatprep.subr.bf16.mxu0 %v6106_v20 }
 0x382   :  { %v4027_v9 = vpop.f32.mrb[26].mxu1 }
 0x383   :  { %v4039_v10 = vand.u32 2147483647, %v4025_v7  ;;  %v5189_v11 = vpop.f32.mrb[27].mxu1  ;;  %v4034_v18 = vmax.f32 %v4025_v7, 0.0 }
 0x384   :  { %5203 = vmatpush3.bf16.msra.mxu0 %v5936_v6 }
 0x385   :  { %v4044_v14 = vsub.f32 0.0, %v4039_v10  ;;  %5204 = vmatprep.subr.bf16.mxu0 %v6106_v20  ;;  %v4949_v20 = vld [vmem:[%s6414_s6] ss:$0 sm:$0xff]  ;;  %s6067_s6 = scalar_lea.vmem %s4484_s30, 128 }
 0x386   :  { %p6068_p4 = scmp.ne.s32.totalorder %s4484_s30, %s6067_s6  ;;  %p6073_p6 = scmp.lt.s32.totalorder %s6067_s6, %s6067_s6 }
 0x387   :  { %v4053_v15 = vmul.f32 1.442695, %v4044_v14 }
 0x388   :  { %5205 = vmatpush3.bf16.msra.mxu0 %v5937_v12  ;;  %p6074_p7 = por %p6073_p6, %p6072_p5 }
 0x389   :  { %5974 = vpow2.f32 %v4053_v15 }
 0x38a   :  { %p6075_p8 = pnand %p6074_p7, %p6068_p4 }
 0x393   :  { %v5975_v16 = vpop.eup %5974 }
 0x394   :  { %v4091_v17 = vadd.f32 1.0, %v5975_v16  ;;  %v4094_v21 = vmul.f32 -0.5, %v5975_v16  ;;  %v4097_v13 = vand.u32 2147483647, %v5975_v16 }
 0x396   :  { %5976 = vlog2.f32 %v4091_v17  ;;  %v4095_v22 = vadd.f32 1.0, %v4094_v21  ;;  %vm4098_vm11 = vcmp.lt.f32.partialorder %v4097_v13, 0.0004427343 }
 0x398   :  { %v4096_v38 = vmul.f32 %v5975_v16, %v4095_v22 }
 0x3a0   :  { %v5977_v24 = vpop.eup %5976 }
 0x3a1   :  { %v4093_v31 = vmul.f32 0.6931472, %v5977_v24 }
 0x3a3   :  { %v4099_v32 = vsel %vm4098_vm11, %v4096_v38, %v4093_v31 }
 0x3a4   :  { %v4104_v34 = vadd.f32 %v4099_v32, %v4034_v18 }
 0x3a6   :  { %v4109_v36 = vpack.c.bf16 %v4104_v34, %v4104_v34 }
 0x3a8   :  { %5207 = vmatmul.mubr.bf16.vlgmr.msra.gmra.mrb[24].mxu0 %v4109_v36 }
 0x43e   :  { %v5127_v37 = vpop.f32.mrb[20].mxu0 }
 0x43f   :  { %v5128_v39 = vpop.f32.mrb[21].mxu0 }
 0x440   :  { %v5129_v40 = vadd.f32 %v5128_v39, %v5127_v37  ;;  %v5130_v55 = vpop.f32.mrb[22].mxu0 }
 0x441   :  { %v5149_v52 = vpop.f32.mrb[28].mxu1  ;;  %v5131_v41 = vpop.f32.mrb[23].mxu0 }
 0x442   :  { %v5150_v63 = vpop.f32.mrb[29].mxu1  ;;  %v4391_v42 = vadd.f32 %v5129_v40, %v4949_v20 }
 0x443   :  { %v5151_v43 = vadd.f32 %v5150_v63, %v5149_v52  ;;  %v5152_v45 = vpop.f32.mrb[30].mxu1 }
 0x444   :  { %v5153_v26 = vpop.f32.mrb[31].mxu1 }
 0x445   :  { %v4431_v19 = vadd.f32 %v5151_v43, %v4391_v42 }
 0x47b   :  { %v4470_v30 = vpop.f32.mrb[24].mxu0 }
 0x47c   :  { %v4471_v50 = vadd.f32 %v4470_v30, %v4431_v19  ;;  %v5208_v48 = vpop.f32.mrb[25].mxu0 }
 0x47d   :  { %v4473_v49 = vpop.f32.mrb[26].mxu0 }
 0x47e   :  { %4476 = vst [vmem:[#allocation10] sm:$0xff] %v4471_v50  ;;  %v5209_v53 = vpop.f32.mrb[27].mxu0 }
 0x47f   :  { %6078 = shalt.err (!%p6075_p8)
}
 0x480   :  { %s6079_s10 = scalar_lea.hbm %s6415_s7, 128 }
 0x481   :  { %p6080_p9 = scmp.ne.s32.totalorder %s6415_s7, %s6079_s10  ;;  %p6083_p10 = scmp.lt.u32.totalorder %s6079_s10, %s6415_s7 }
 0x483   :  { %p6085_p11 = pnand %p6083_p10, %p6080_p9 }
 0x485   :  { %6088 = shalt.err (!%p6085_p11)
}
 0x486   :  { %4486 = dma.vmem_to_hbm [thread:$0]  %s4484_s30, 128, %s6415_s7, [#allocation4]  }
 0x487   :  { %6095 = dma.done.wait [#allocation4], 128  }
 0x488   :  { %6096 = vsyncadd [#allocation4], 4294967168 }
 0x489   :  { %4490 = vsyncpa [#allocation3], 1 }
 0x48a   :  { %4491 = vsyncpa [#allocation6], 1 }
 0x48b   :  { %4492 = vsyncpa [#allocation9], 1 }
 0x48c   :  { %4493 = vsyncpa [#allocation4], 1 }

</bundles_post_ra>
